<compile_context>
chip_gen: v7x
topology: tpu7x:2x2x1
jax: 0.10.0
libtpu: 0.0.40
codegen_flags: <defaults>
</compile_context>

<pallas_src>
import numpy as np
import jax
import jax.numpy as jnp
from jax import lax
from jax.experimental import pallas as pl
from jax.experimental.pallas import tpu as pltpu

# ---- architecture constants implied by __init__ (radii=[8]) ----
RADIUS = 8
W = H = 2 * RADIUS + 1        # 17
C_IN = 1                      # len(radii)
C1 = 10                       # conv1 out channels
C2 = 20                       # conv2 out channels
K = 5                         # conv kernel size
S1 = W - K + 1                # 13 (after conv1)
P1 = S1 // 2                  # 6  (after maxpool1)
S2 = P1 - K + 1               # 2  (after conv2)
P2 = S2 // 2                  # 1  (after maxpool2)
LATENT = 20
FLAT = C2 * P2 * P2           # 20 (flattened features into the linear)
PATCH = H * W                 # 289 (flattened input patch)
PATCH_P = 384                 # 289 padded up to a multiple of 128 (lane-clean loads)
FEAT1 = P1 * P1 * C1          # 360 (pooled conv1 features, lane = y*60 + x*10 + co)
FEAT1_P = 384                 # 360 padded up to a multiple of 128 (vreg-aligned slab slices)
N1 = 4 * FEAT1_P              # 1536: 4 pool-parity slabs concatenated along N
GRP2 = 32                     # lane spacing of the 4 packed conv2 slabs
N2 = 4 * GRP2                 # 128: packed conv2 matmul width
FLAT_P = GRP2                 # 32: padded flattened-feature dim fed to the linear

SELU_ALPHA = 1.6732632423543772848170429916717
SELU_SCALE = 1.0507009873554804934193349852946


def _selu(x):
    # scale * (max(0,x) + min(0, alpha*(exp(x)-1))), overflow-safe negative branch (f32)
    neg = SELU_ALPHA * (jnp.exp(jnp.minimum(x, 0.0)) - 1.0)
    return SELU_SCALE * jnp.where(x > 0, x, neg)


# ------------------ Pallas kernel (one batch block per grid step) ------------------
def convnet_kernel(x_ref, w1c_ref, b1_ref, w2p_ref, b2_ref, w3_ref, b3_ref, out_ref):
    # x_ref   : (B, 384)  bf16   flattened+padded 17x17 patches
    # w1c_ref : (384, 1536) bf16 conv1 Toeplitz slabs, 4 pool parities concatenated along N
    # b1_ref  : (1, 384)  f32    conv1 bias tiled over the 6x6 pooled grid (zeros past 360)
    # w2p_ref : (384, 128) bf16  conv2 im2col slabs, slab oo in lanes [32*oo, 32*oo+20)
    # b2_ref  : (1, 32)   f32    conv2 bias (zeros past 20)
    # w3_ref  : (32, 20)  bf16   linear weight [in(padded), out]
    # b3_ref  : (1, 20)   f32
    # out_ref : (B, 20)   f32
    x = x_ref[...]                                                       # (B, 384) bf16

    # conv1 + maxpool(2) + SELU: one wide matmul, max over 4 vreg-aligned 384-lane
    # slices, then bias + SELU (exact: bias shared across candidates, SELU monotone).
    cf = jnp.dot(x, w1c_ref[...], preferred_element_type=jnp.float32)    # (B, 1536) f32
    c = jnp.maximum(
        jnp.maximum(cf[:, 0 * FEAT1_P:1 * FEAT1_P], cf[:, 1 * FEAT1_P:2 * FEAT1_P]),
        jnp.maximum(cf[:, 2 * FEAT1_P:3 * FEAT1_P], cf[:, 3 * FEAT1_P:4 * FEAT1_P]))
    p1 = _selu(c + b1_ref[...])                                          # (B, 384) f32 (lanes 360.. = 0)

    # conv2 + maxpool(2) + SELU: one packed N=128 matmul, max over 4 lane groups of 32.
    zf = jnp.dot(p1.astype(jnp.bfloat16), w2p_ref[...],
                 preferred_element_type=jnp.float32)                     # (B, 128) f32
    z = jnp.maximum(
        jnp.maximum(zf[:, 0 * GRP2:1 * GRP2], zf[:, 1 * GRP2:2 * GRP2]),
        jnp.maximum(zf[:, 2 * GRP2:3 * GRP2], zf[:, 3 * GRP2:4 * GRP2]))
    p2 = _selu(z + b2_ref[...])                                          # (B, 32) f32 (lanes 20.. = 0)

    # Linear(20 -> 20)  (padded rows of w3 are zero, padded lanes of p2 are zero)
    out_ref[...] = (jnp.dot(p2.astype(jnp.bfloat16), w3_ref[...],
                            preferred_element_type=jnp.float32) + b3_ref[...])


# -------------------------- host-side glue --------------------------
def init_params(key):
    k1, k2, k3, k4, k5, k6 = jax.random.split(key, 6)

    def u(k, shape, fan_in):
        bound = 1.0 / np.sqrt(fan_in)
        return jax.random.uniform(k, shape, jnp.float32, -bound, bound)

    w1 = u(k1, (C1, C_IN, K, K), C_IN * K * K)
    b1 = u(k2, (C1,), C_IN * K * K)
    w2 = u(k3, (C2, C1, K, K), C1 * K * K)
    b2 = u(k4, (C2,), C1 * K * K)
    w3 = u(k5, (LATENT, FLAT), FLAT)
    b3 = u(k6, (LATENT,), FLAT)
    return w1, b1, w2, b2, w3, b3


def prepare_params(w1, b1, w2, b2, w3, b3):
    """One-time weight preprocessing (glue): build the fused conv+pool matmul slabs (bf16)."""
    w1n = np.asarray(jax.device_get(w1), np.float32)   # (10, 1, 5, 5)
    b1n = np.asarray(jax.device_get(b1), np.float32)
    w2n = np.asarray(jax.device_get(w2), np.float32)   # (20, 10, 5, 5)
    b2n = np.asarray(jax.device_get(b2), np.float32)
    w3n = np.asarray(jax.device_get(w3), np.float32)   # (20, 20) [out, in]
    b3n = np.asarray(jax.device_get(b3), np.float32)

    # conv1 slabs: for pool parity dd=(dy,dx), column dd*384 + (y*60 + x*10 + co) carries the
    # conv1 output channel co at pixel (2y+dy, 2x+dx); row r = flattened input pixel index.
    w1c = np.zeros((PATCH_P, N1), np.float32)
    for dy in range(2):
        for dx in range(2):
            col0 = (dy * 2 + dx) * FEAT1_P
            for y in range(P1):
                for x in range(P1):
                    base = col0 + y * (P1 * C1) + x * C1
                    for ky in range(K):
                        for kx in range(K):
                            r = (2 * y + dy + ky) * W + (2 * x + dx + kx)
                            w1c[r, base:base + C1] = w1n[:, 0, ky, kx]
    b1p = np.zeros((1, FEAT1_P), np.float32)
    b1p[0, :FEAT1] = np.tile(b1n, P1 * P1)

    # conv2 slabs: for output pixel oo=(oy,ox), lane 32*oo + c2 reads pooled-1 lane
    # (oy+ky)*60 + (ox+kx)*10 + co with weight w2[c2, co, ky, kx].
    w2p = np.zeros((FEAT1_P, N2), np.float32)
    for oy in range(2):
        for ox in range(2):
            lane0 = (oy * 2 + ox) * GRP2
            for ky in range(K):
                for kx in range(K):
                    for co in range(C1):
                        r = (oy + ky) * (P1 * C1) + (ox + kx) * C1 + co
                        w2p[r, lane0:lane0 + C2] = w2n[:, co, ky, kx]
    b2p = np.zeros((1, GRP2), np.float32)
    b2p[0, :C2] = b2n

    w3p = np.zeros((FLAT_P, LATENT), np.float32)       # [in(padded to 32), out]
    w3p[:FLAT, :] = w3n.T
    b3p = b3n[None, :]                                 # (1, 20)

    return (jnp.asarray(w1c, jnp.bfloat16), jnp.asarray(b1p, jnp.float32),
            jnp.asarray(w2p, jnp.bfloat16), jnp.asarray(b2p, jnp.float32),
            jnp.asarray(w3p, jnp.bfloat16), jnp.asarray(b3p, jnp.float32))


def convnet_forward(x_nchw, prepped, block_b=1024):
    w1c, b1p, w2p, b2p, w3p, b3p = prepped
    n = x_nchw.shape[0]
    assert x_nchw.shape == (n, C_IN, H, W)
    x2 = x_nchw.astype(jnp.float32).reshape(n, PATCH)            # glue: squeeze Cin=1, flatten
    x2 = jnp.pad(x2, ((0, 0), (0, PATCH_P - PATCH)))             # lane-pad 289 -> 384

    if n <= block_b:
        bb, n_pad = n, n                                         # single full-size block
    else:
        bb = block_b
        n_pad = pl.cdiv(n, bb) * bb
        if n_pad != n:
            x2 = jnp.pad(x2, ((0, n_pad - n), (0, 0)))           # zero-pad ragged tail (glue)
    x2 = x2.astype(jnp.bfloat16)                                 # bf16 MXU operand (f32 accum in kernel)

    out = pl.pallas_call(
        convnet_kernel,
        out_shape=jax.ShapeDtypeStruct((n_pad, LATENT), jnp.float32),
        grid_spec=pltpu.PrefetchScalarGridSpec(
            num_scalar_prefetch=0,
            grid=(n_pad // bb,),
            in_specs=[
                pl.BlockSpec((bb, PATCH_P), lambda i: (i, 0)),
                pl.BlockSpec((PATCH_P, N1), lambda i: (0, 0)),
                pl.BlockSpec((1, FEAT1_P), lambda i: (0, 0)),
                pl.BlockSpec((FEAT1_P, N2), lambda i: (0, 0)),
                pl.BlockSpec((1, GRP2), lambda i: (0, 0)),
                pl.BlockSpec((FLAT_P, LATENT), lambda i: (0, 0)),
                pl.BlockSpec((1, LATENT), lambda i: (0, 0)),
            ],
            out_specs=pl.BlockSpec((bb, LATENT), lambda i: (i, 0)),
        ),
        compiler_params=pltpu.CompilerParams(dimension_semantics=("parallel",)),
    )(x2, w1c, b1p, w2p, b2p, w3p, b3p)
    return out[:n]


# ---------------- pure-JAX reference (f32, verification only) ----------------
def _maxpool2_ref(y):   # NCHW, kernel=2, stride=2, floor
    n, c, h, w = y.shape
    h2, w2 = (h // 2) * 2, (w // 2) * 2
    y = y[:, :, :h2, :w2]
    return jnp.max(y.reshape(n, c, h2 // 2, 2, w2 // 2, 2), axis=(3, 5))


def ref_forward(x, w1, b1, w2, b2, w3, b3):
    dn = ('NCHW', 'OIHW', 'NCHW')
    y = lax.conv_general_dilated(x, w1, (1, 1), 'VALID', dimension_numbers=dn)
    y = jax.nn.selu(y + b1[None, :, None, None])
    y = _maxpool2_ref(y)
    y = lax.conv_general_dilated(y, w2, (1, 1), 'VALID', dimension_numbers=dn)
    y = jax.nn.selu(y + b2[None, :, None, None])
    y = _maxpool2_ref(y)
    y = y.reshape(y.shape[0], -1)
    return y @ w3.T + b3


if __name__ == "__main__":
    key = jax.random.PRNGKey(0)
    kx, kx2, kp = jax.random.split(key, 3)
    params = init_params(kp)
    prepped = prepare_params(*params)

    # small demo batch (single block, bb = n = 2)
    x = jax.random.normal(kx, (2, C_IN, H, W), jnp.float32)
    out = convnet_forward(x, prepped)
    jax.block_until_ready(out)
    ref = ref_forward(x, *params)
    # bf16 MXU operands (f32 accumulation): tolerance relaxed vs. the pure-f32 path
    np.testing.assert_allclose(np.asarray(out), np.asarray(ref), rtol=5e-2, atol=5e-2)
    assert out.shape == (2, LATENT)

    # larger batch exercising the multi-block path (grid > 1, ragged tail padding)
    xb = jax.random.normal(kx2, (600, C_IN, H, W), jnp.float32)
    outb = convnet_forward(xb, prepped, block_b=256)
    jax.block_until_ready(outb)
    refb = ref_forward(xb, *params)
    np.testing.assert_allclose(np.asarray(outb), np.asarray(refb), rtol=5e-2, atol=5e-2)
    assert outb.shape == (600, LATENT)

    print("KERNEL_OK")
</pallas_src>

<mosaic_0001>
module attributes {stable_mosaic.version = 11 : i64} {
  func.func @convnet_kernel(%arg0: i32, %arg1: memref<2x384xbf16, #tpu.memory_space<vmem>>, %arg2: memref<384x1536xbf16, #tpu.memory_space<vmem>>, %arg3: memref<1x384xf32, #tpu.memory_space<vmem>>, %arg4: memref<384x128xbf16, #tpu.memory_space<vmem>>, %arg5: memref<1x32xf32, #tpu.memory_space<vmem>>, %arg6: memref<32x20xbf16, #tpu.memory_space<vmem>>, %arg7: memref<1x20xf32, #tpu.memory_space<vmem>>, %arg8: memref<2x20xf32, #tpu.memory_space<vmem>>) attributes {dimension_semantics = [#tpu.dimension_semantics<parallel>], iteration_bounds = array<i64: 1>, scalar_prefetch = 0 : i64, scratch_operands = 0 : i64, tpu.core_type = #tpu.core_type<tc>, window_params = [{transform_indices = @transform_0, window_bounds = array<i64: 2, 384>}, {pipeline_mode = #tpu.pipeline_mode<synchronous>, transform_indices = @transform_1, window_bounds = array<i64: 384, 1536>}, {pipeline_mode = #tpu.pipeline_mode<synchronous>, transform_indices = @transform_2, window_bounds = array<i64: 1, 384>}, {pipeline_mode = #tpu.pipeline_mode<synchronous>, transform_indices = @transform_3, window_bounds = array<i64: 384, 128>}, {pipeline_mode = #tpu.pipeline_mode<synchronous>, transform_indices = @transform_4, window_bounds = array<i64: 1, 32>}, {pipeline_mode = #tpu.pipeline_mode<synchronous>, transform_indices = @transform_5, window_bounds = array<i64: 32, 20>}, {pipeline_mode = #tpu.pipeline_mode<synchronous>, transform_indices = @transform_6, window_bounds = array<i64: 1, 20>}, {transform_indices = @transform_7, window_bounds = array<i64: 2, 20>}]} {
    %c0 = arith.constant 0 : index
    %c0_0 = arith.constant 0 : index
    %0 = vector.load %arg1[%c0, %c0_0] : memref<2x384xbf16, #tpu.memory_space<vmem>>, vector<2x384xbf16>
    %c0_1 = arith.constant 0 : index
    %c0_2 = arith.constant 0 : index
    %1 = vector.load %arg2[%c0_1, %c0_2] : memref<384x1536xbf16, #tpu.memory_space<vmem>>, vector<384x1536xbf16>
    %cst = arith.constant dense<0.000000e+00> : vector<2x1536xf32>
    %2 = tpu.matmul %0, %1, %cst {dimension_numbers = #tpu.dot_dimension_numbers<[1], [0], [0], [1], [0, 0, 1, 1], [], []>} : vector<2x384xbf16>, vector<384x1536xbf16>, vector<2x1536xf32> -> vector<2x1536xf32>
    %3 = vector.extract_strided_slice %2 {offsets = [0, 0], sizes = [2, 384], strides = [1, 1]} : vector<2x1536xf32> to vector<2x384xf32>
    %4 = vector.extract_strided_slice %2 {offsets = [0, 384], sizes = [2, 384], strides = [1, 1]} : vector<2x1536xf32> to vector<2x384xf32>
    %5 = arith.maximumf %3, %4 : vector<2x384xf32>
    %6 = vector.extract_strided_slice %2 {offsets = [0, 768], sizes = [2, 384], strides = [1, 1]} : vector<2x1536xf32> to vector<2x384xf32>
    %7 = vector.extract_strided_slice %2 {offsets = [0, 1152], sizes = [2, 384], strides = [1, 1]} : vector<2x1536xf32> to vector<2x384xf32>
    %8 = arith.maximumf %6, %7 : vector<2x384xf32>
    %9 = arith.maximumf %5, %8 : vector<2x384xf32>
    %c0_3 = arith.constant 0 : index
    %c0_4 = arith.constant 0 : index
    %10 = vector.load %arg3[%c0_3, %c0_4] : memref<1x384xf32, #tpu.memory_space<vmem>>, vector<1x384xf32>
    %11 = vector.broadcast %10 : vector<1x384xf32> to vector<2x384xf32>
    %12 = arith.addf %9, %11 : vector<2x384xf32>
    %cst_5 = arith.constant 0.000000e+00 : f32
    %13 = vector.broadcast %cst_5 : f32 to vector<2x384xf32>
    %14 = arith.minimumf %12, %13 : vector<2x384xf32>
    %15 = math.exp %14 : vector<2x384xf32>
    %cst_6 = arith.constant 1.000000e+00 : f32
    %16 = vector.broadcast %cst_6 : f32 to vector<2x384xf32>
    %17 = arith.subf %15, %16 : vector<2x384xf32>
    %cst_7 = arith.constant 1.67326319 : f32
    %18 = vector.broadcast %cst_7 : f32 to vector<2x384xf32>
    %19 = arith.mulf %18, %17 : vector<2x384xf32>
    %cst_8 = arith.constant 0.000000e+00 : f32
    %20 = vector.broadcast %cst_8 : f32 to vector<2x384xf32>
    %21 = arith.cmpf ogt, %12, %20 : vector<2x384xf32>
    %22 = arith.select %21, %12, %19 : vector<2x384xi1>, vector<2x384xf32>
    %cst_9 = arith.constant 1.05070102 : f32
    %23 = vector.broadcast %cst_9 : f32 to vector<2x384xf32>
    %24 = arith.mulf %23, %22 : vector<2x384xf32>
    %25 = arith.truncf %24 : vector<2x384xf32> to vector<2x384xbf16>
    %c0_10 = arith.constant 0 : index
    %c0_11 = arith.constant 0 : index
    %26 = vector.load %arg4[%c0_10, %c0_11] : memref<384x128xbf16, #tpu.memory_space<vmem>>, vector<384x128xbf16>
    %cst_12 = arith.constant dense<0.000000e+00> : vector<2x128xf32>
    %27 = tpu.matmul %25, %26, %cst_12 {dimension_numbers = #tpu.dot_dimension_numbers<[1], [0], [0], [1], [0, 0, 1, 1], [], []>} : vector<2x384xbf16>, vector<384x128xbf16>, vector<2x128xf32> -> vector<2x128xf32>
    %28 = vector.extract_strided_slice %27 {offsets = [0, 0], sizes = [2, 32], strides = [1, 1]} : vector<2x128xf32> to vector<2x32xf32>
    %29 = vector.extract_strided_slice %27 {offsets = [0, 32], sizes = [2, 32], strides = [1, 1]} : vector<2x128xf32> to vector<2x32xf32>
    %30 = arith.maximumf %28, %29 : vector<2x32xf32>
    %31 = vector.extract_strided_slice %27 {offsets = [0, 64], sizes = [2, 32], strides = [1, 1]} : vector<2x128xf32> to vector<2x32xf32>
    %32 = vector.extract_strided_slice %27 {offsets = [0, 96], sizes = [2, 32], strides = [1, 1]} : vector<2x128xf32> to vector<2x32xf32>
    %33 = arith.maximumf %31, %32 : vector<2x32xf32>
    %34 = arith.maximumf %30, %33 : vector<2x32xf32>
    %c0_13 = arith.constant 0 : index
    %c0_14 = arith.constant 0 : index
    %35 = vector.load %arg5[%c0_13, %c0_14] : memref<1x32xf32, #tpu.memory_space<vmem>>, vector<1x32xf32>
    %36 = vector.broadcast %35 : vector<1x32xf32> to vector<2x32xf32>
    %37 = arith.addf %34, %36 : vector<2x32xf32>
    %cst_15 = arith.constant 0.000000e+00 : f32
    %38 = vector.broadcast %cst_15 : f32 to vector<2x32xf32>
    %39 = arith.minimumf %37, %38 : vector<2x32xf32>
    %40 = math.exp %39 : vector<2x32xf32>
    %cst_16 = arith.constant 1.000000e+00 : f32
    %41 = vector.broadcast %cst_16 : f32 to vector<2x32xf32>
    %42 = arith.subf %40, %41 : vector<2x32xf32>
    %cst_17 = arith.constant 1.67326319 : f32
    %43 = vector.broadcast %cst_17 : f32 to vector<2x32xf32>
    %44 = arith.mulf %43, %42 : vector<2x32xf32>
    %cst_18 = arith.constant 0.000000e+00 : f32
    %45 = vector.broadcast %cst_18 : f32 to vector<2x32xf32>
    %46 = arith.cmpf ogt, %37, %45 : vector<2x32xf32>
    %47 = arith.select %46, %37, %44 : vector<2x32xi1>, vector<2x32xf32>
    %cst_19 = arith.constant 1.05070102 : f32
    %48 = vector.broadcast %cst_19 : f32 to vector<2x32xf32>
    %49 = arith.mulf %48, %47 : vector<2x32xf32>
    %50 = arith.truncf %49 : vector<2x32xf32> to vector<2x32xbf16>
    %c0_20 = arith.constant 0 : index
    %c0_21 = arith.constant 0 : index
    %51 = vector.load %arg6[%c0_20, %c0_21] : memref<32x20xbf16, #tpu.memory_space<vmem>>, vector<32x20xbf16>
    %cst_22 = arith.constant dense<0.000000e+00> : vector<2x20xf32>
    %52 = tpu.matmul %50, %51, %cst_22 {dimension_numbers = #tpu.dot_dimension_numbers<[1], [0], [0], [1], [0, 0, 1, 1], [], []>} : vector<2x32xbf16>, vector<32x20xbf16>, vector<2x20xf32> -> vector<2x20xf32>
    %c0_23 = arith.constant 0 : index
    %c0_24 = arith.constant 0 : index
    %53 = vector.load %arg7[%c0_23, %c0_24] : memref<1x20xf32, #tpu.memory_space<vmem>>, vector<1x20xf32>
    %54 = vector.broadcast %53 : vector<1x20xf32> to vector<2x20xf32>
    %55 = arith.addf %52, %54 : vector<2x20xf32>
    %c0_25 = arith.constant 0 : index
    %c0_26 = arith.constant 0 : index
    %56 = vector.load %arg8[%c0_25, %c0_26] : memref<2x20xf32, #tpu.memory_space<vmem>>, vector<2x20xf32>
    tpu.vector_store %arg8[%c0_25, %c0_26], %55 {strides = array<i32>} : memref<2x20xf32, #tpu.memory_space<vmem>>, vector<2x20xf32>,
    return
  }
  func.func @transform_0(%arg0: i32) -> (i32, i32) {
    %c0_i32 = arith.constant 0 : i32
    %c0_i32_0 = arith.constant 0 : i32
    return %arg0, %c0_i32 : i32, i32
  }
  func.func @transform_1(%arg0: i32) -> (i32, i32) {
    %c0_i32 = arith.constant 0 : i32
    %c0_i32_0 = arith.constant 0 : i32
    %c0_i32_1 = arith.constant 0 : i32
    return %c0_i32, %c0_i32_0 : i32, i32
  }
  func.func @transform_2(%arg0: i32) -> (i32, i32) {
    %c0_i32 = arith.constant 0 : i32
    %c0_i32_0 = arith.constant 0 : i32
    %c0_i32_1 = arith.constant 0 : i32
    return %c0_i32, %c0_i32_0 : i32, i32
  }
  func.func @transform_3(%arg0: i32) -> (i32, i32) {
    %c0_i32 = arith.constant 0 : i32
    %c0_i32_0 = arith.constant 0 : i32
    %c0_i32_1 = arith.constant 0 : i32
    return %c0_i32, %c0_i32_0 : i32, i32
  }
  func.func @transform_4(%arg0: i32) -> (i32, i32) {
    %c0_i32 = arith.constant 0 : i32
    %c0_i32_0 = arith.constant 0 : i32
    %c0_i32_1 = arith.constant 0 : i32
    return %c0_i32, %c0_i32_0 : i32, i32
  }
  func.func @transform_5(%arg0: i32) -> (i32, i32) {
    %c0_i32 = arith.constant 0 : i32
    %c0_i32_0 = arith.constant 0 : i32
    %c0_i32_1 = arith.constant 0 : i32
    return %c0_i32, %c0_i32_0 : i32, i32
  }
  func.func @transform_6(%arg0: i32) -> (i32, i32) {
    %c0_i32 = arith.constant 0 : i32
    %c0_i32_0 = arith.constant 0 : i32
    %c0_i32_1 = arith.constant 0 : i32
    return %c0_i32, %c0_i32_0 : i32, i32
  }
  func.func @transform_7(%arg0: i32) -> (i32, i32) {
    %c0_i32 = arith.constant 0 : i32
    %c0_i32_0 = arith.constant 0 : i32
    return %arg0, %c0_i32 : i32, i32
  }
}

</mosaic_0001>

<bundles_post_ra>
// kernel: tpu_custom_call.1
= control target key start
LH: loop header
LB: loop body
LE: loop exit
PB: predicated region body
PF: predicated region fallthrough
CT: control target
= control target key end

     0   :  { %12 = vsyncpa [#allocation3], 0  ;;  %s4062_s0 = inlined_call_operand.hbm [shape: bf16[2,384], index: 0, kind: input, shape index: {}]   ;;  %s4063_s1 = inlined_call_operand.hbm [shape: bf16[384,1536], index: 1, kind: input, shape index: {}]   ;;  %s4064_s2 = inlined_call_operand.hbm [shape: f32[1,384], index: 2, kind: input, shape index: {}]   ;;  %s4065_s3 = inlined_call_operand.hbm [shape: bf16[384,128], index: 3, kind: input, shape index: {}]   ;;  %s4066_s4 = inlined_call_operand.hbm [shape: f32[1,32], index: 4, kind: input, shape index: {}]   ;;  %s4067_s5 = inlined_call_operand.vmem [shape: bf16[32,20], index: 5, kind: input, shape index: {}]   ;;  %s4068_s6 = inlined_call_operand.hbm [shape: f32[1,20], index: 6, kind: input, shape index: {}]   ;;  %s4069_s7 = inlined_call_operand.hbm [shape: f32[2,20], index: 7, kind: output, shape index: {}]  }
   0x1   :  { %13 = vsyncpa [#allocation6], 0 }
   0x2   :  { %14 = vsyncpa [#allocation9], 0 }
   0x3   :  { %15 = vsyncpa [#allocation12], 0 }
   0x4   :  { %16 = vsyncpa [#allocation4], 0  ;;  %s3846_s24 = smov [#allocation5]   ;;  %s3682_s28 = scalar_lea.hbm %s4063_s1, 36864 }
   0x5   :  { %s32_s25 = sshll.u32 %s3846_s24, 4  ;;  %p3683_p0 = scmp.ne.s32.totalorder %s4063_s1, %s3682_s28  ;;  %s33_s25 = int_to_ptr.vmem [resolvable:$true] %s32_s25 }
   0x6   :  { %p3686_p1 = scmp.lt.u32.totalorder %s3682_s28, %s4063_s1 }
   0x8   :  { %p3688_p2 = pnand %p3686_p1, %p3683_p0 }
   0xa   :  { %3691 = shalt.err (!%p3688_p2)
}
   0xb   :  { %s3692_s10 = scalar_lea.vmem %s33_s25, 36864  ;;  %p3697_p4 = scmp.lt.s32.totalorder %s33_s25, %s33_s25 }
   0xc   :  { %p3693_p3 = scmp.ne.s32.totalorder %s33_s25, %s3692_s10  ;;  %p3698_p5 = scmp.lt.s32.totalorder %s3692_s10, %s3692_s10 }
   0xe   :  { %p3699_p6 = por %p3698_p5, %p3697_p4 }
  0x10   :  { %p3700_p7 = pnand %p3699_p6, %p3693_p3 }
  0x12   :  { %3703 = shalt.err (!%p3700_p7)
}
  0x13   :  { %s3847_s11 = smov 768   ;;  %s3848_s12 = smov 48  }
  0x14   :  { %38 = dma.hbm_to_vmem [thread:$0]  %s4063_s1, 36864, %s33_s25, [#allocation6], %s3847_s11, %s3847_s11, %s3848_s12  }
  0x15   :  { %s3849_s15 = smov [#allocation8]   ;;  %s3704_s19 = scalar_lea.hbm %s4065_s3, 3072 }
  0x16   :  { %s54_s16 = sshll.u32 %s3849_s15, 4  ;;  %p3705_p8 = scmp.ne.s32.totalorder %s4065_s3, %s3704_s19  ;;  %s55_s16 = int_to_ptr.vmem [resolvable:$true] %s54_s16 }
  0x17   :  { %p3708_p9 = scmp.lt.u32.totalorder %s3704_s19, %s4065_s3 }
  0x19   :  { %p3710_p10 = pnand %p3708_p9, %p3705_p8 }
  0x1b   :  { %3713 = shalt.err (!%p3710_p10)
}
  0x1c   :  { %s3714_s24 = scalar_lea.vmem %s55_s16, 3072  ;;  %p3719_p12 = scmp.lt.s32.totalorder %s55_s16, %s55_s16 }
  0x1d   :  { %p3715_p11 = scmp.ne.s32.totalorder %s55_s16, %s3714_s24  ;;  %p3720_p13 = scmp.lt.s32.totalorder %s3714_s24, %s3714_s24 }
  0x1f   :  { %p3721_p0 = por %p3720_p13, %p3719_p12 }
  0x21   :  { %p3722_p1 = pnand %p3721_p0, %p3715_p11 }
  0x23   :  { %3725 = shalt.err (!%p3722_p1)
}
  0x24   :  { %s3850_s1 = smov 64   ;;  %s3851_s25 = smov 4  }
  0x25   :  { %60 = dma.hbm_to_vmem [thread:$0]  %s4065_s3, 3072, %s55_s16, [#allocation9], %s3850_s1, %s3850_s1, %s3851_s25  }
  0x26   :  { %s3852_s28 = smov [#allocation2]   ;;  %s3853_s30 = smov [#allocation7]  }
  0x27   :  { %s23_s29 = sshll.u32 %s3852_s28, 4  ;;  %s45_s8 = sshll.u32 %s3853_s30, 4  ;;  %s24_s29 = int_to_ptr.vmem [resolvable:$true] %s23_s29  ;;  %s46_s8 = int_to_ptr.vmem [resolvable:$true] %s45_s8 }
  0x28   :  { %s3726_s11 = scalar_lea.hbm %s4062_s0, 48 }
  0x29   :  { %p3727_p2 = scmp.ne.s32.totalorder %s4062_s0, %s3726_s11  ;;  %p3730_p3 = scmp.lt.u32.totalorder %s3726_s11, %s4062_s0 }
  0x2b   :  { %p3732_p4 = pnand %p3730_p3, %p3727_p2 }
  0x2d   :  { %3735 = shalt.err (!%p3732_p4)
}
  0x2e   :  { %s3736_s3 = scalar_lea.vmem %s24_s29, 48  ;;  %s3740_s16 = scalar_lea.vmem %s24_s29, 64 }
  0x2f   :  { %p3737_p5 = scmp.ne.s32.totalorder %s24_s29, %s3736_s3  ;;  %p3741_p6 = scmp.lt.s32.totalorder %s24_s29, %s24_s29 }
  0x30   :  { %p3742_p7 = scmp.lt.s32.totalorder %s3740_s16, %s3736_s3 }
  0x32   :  { %p3743_p8 = por %p3742_p7, %p3741_p6 }
  0x34   :  { %p3744_p9 = pnand %p3743_p8, %p3737_p5 }
  0x36   :  { %3747 = shalt.err (!%p3744_p9)
}
  0x37   :  { %26 = dma.hbm_to_vmem [thread:$0]  %s4062_s0, 48, %s24_s29, [#allocation3]  }
  0x38   :  { %s3748_s21 = scalar_lea.hbm %s4064_s2, 48 }
  0x39   :  { %p3749_p10 = scmp.ne.s32.totalorder %s4064_s2, %s3748_s21  ;;  %p3752_p11 = scmp.lt.u32.totalorder %s3748_s21, %s4064_s2 }
  0x3b   :  { %p3754_p12 = pnand %p3752_p11, %p3749_p10 }
  0x3d   :  { %3757 = shalt.err (!%p3754_p12)
}
  0x3e   :  { %s3758_s26 = scalar_lea.vmem %s46_s8, 48  ;;  %s3762_s27 = scalar_lea.vmem %s46_s8, 64 }
  0x3f   :  { %p3759_p13 = scmp.ne.s32.totalorder %s46_s8, %s3758_s26  ;;  %p3763_p0 = scmp.lt.s32.totalorder %s46_s8, %s46_s8 }
  0x40   :  { %p3764_p1 = scmp.lt.s32.totalorder %s3762_s27, %s3758_s26 }
  0x42   :  { %p3765_p2 = por %p3764_p1, %p3763_p0 }
  0x44   :  { %p3766_p3 = pnand %p3765_p2, %p3759_p13 }
  0x46   :  { %3769 = shalt.err (!%p3766_p3)
}
  0x47   :  { %48 = dma.hbm_to_vmem [thread:$0]  %s4064_s2, 48, %s46_s8, [#allocation6]  }
  0x48   :  { %s3854_s29 = smov [#allocation10]   ;;  %s3855_s9 = smov [#allocation11]  }
  0x49   :  { %s67_s30 = sshll.u32 %s3854_s29, 4  ;;  %s79_s10 = sshll.u32 %s3855_s9, 4  ;;  %s68_s30 = int_to_ptr.vmem [resolvable:$true] %s67_s30  ;;  %s80_s10 = int_to_ptr.vmem [resolvable:$true] %s79_s10 }
  0x4a   :  { %s3770_s13 = scalar_lea.hbm %s4066_s4, 16 }
  0x4b   :  { %p3771_p4 = scmp.ne.s32.totalorder %s4066_s4, %s3770_s13  ;;  %p3774_p5 = scmp.lt.u32.totalorder %s3770_s13, %s4066_s4 }
  0x4d   :  { %p3776_p6 = pnand %p3774_p5, %p3771_p4 }
  0x4f   :  { %3779 = shalt.err (!%p3776_p6)
}
  0x50   :  { %s3780_s2 = scalar_lea.vmem %s68_s30, 16  ;;  %s3784_s8 = scalar_lea.vmem %s68_s30, 32 }
  0x51   :  { %p3781_p7 = scmp.ne.s32.totalorder %s68_s30, %s3780_s2  ;;  %p3785_p8 = scmp.lt.s32.totalorder %s68_s30, %s68_s30 }
  0x52   :  { %p3786_p9 = scmp.lt.s32.totalorder %s3784_s8, %s3780_s2 }
  0x54   :  { %p3787_p10 = por %p3786_p9, %p3785_p8 }
  0x56   :  { %p3788_p11 = pnand %p3787_p10, %p3781_p7 }
  0x58   :  { %3791 = shalt.err (!%p3788_p11)
}
  0x59   :  { %70 = dma.hbm_to_vmem [thread:$0]  %s4066_s4, 16, %s68_s30, [#allocation9]  }
  0x5a   :  { %s3792_s21 = scalar_lea.hbm %s4068_s6, 16 }
  0x5b   :  { %p3793_p12 = scmp.ne.s32.totalorder %s4068_s6, %s3792_s21  ;;  %p3796_p13 = scmp.lt.u32.totalorder %s3792_s21, %s4068_s6 }
  0x5d   :  { %p3798_p0 = pnand %p3796_p13, %p3793_p12 }
  0x5f   :  { %3801 = shalt.err (!%p3798_p0)
}
  0x60   :  { %s3802_s26 = scalar_lea.vmem %s80_s10, 16  ;;  %s3806_s27 = scalar_lea.vmem %s80_s10, 32 }
  0x61   :  { %p3803_p1 = scmp.ne.s32.totalorder %s80_s10, %s3802_s26  ;;  %p3807_p2 = scmp.lt.s32.totalorder %s80_s10, %s80_s10 }
  0x62   :  { %p3808_p3 = scmp.lt.s32.totalorder %s3806_s27, %s3802_s26 }
  0x64   :  { %p3809_p4 = por %p3808_p3, %p3807_p2 }
  0x66   :  { %p3810_p5 = pnand %p3809_p4, %p3803_p1 }
  0x68   :  { %3813 = shalt.err (!%p3810_p5)
}
  0x69   :  { %82 = dma.hbm_to_vmem [thread:$0]  %s4068_s6, 16, %s80_s10, [#allocation12]  }
  0x6a   :  { %3836 = dma.done.wait [#allocation3], 48  }
  0x6b   :  { %3837 = vsyncadd [#allocation3], 4294967248 }
  0x6c   :  { %3838 = dma.done.wait [#allocation6], 36912  }
  0x6d   :  { %3839 = vsyncadd [#allocation6], 4294930384 }
  0x6e   :  { %3840 = dma.done.wait [#allocation9], 3088  }
  0x6f   :  { %3841 = vsyncadd [#allocation9], 4294964208 }
  0x70   :  { %3842 = dma.done.wait [#allocation12], 16  }
  0x71   :  { %3843 = vsyncadd [#allocation12], 4294967280  ;;  %v3216_v0 = vld [vmem:[#allocation5 + $0x4] ss:$48 sps:$4 sm:$0xff]   ;;  %v3218_v1 = vld [vmem:[#allocation5 + $0xc] ss:$48 sps:$4 sm:$0xff]   ;;  %v403_v40 = vlaneseq }
  0x72   :  { %1858 = vmatprep.subr.bf16.mxu0 %v3216_v0  ;;  %v3220_v2 = vld [vmem:[#allocation5] ss:$48 sps:$4 sm:$0xff]   ;;  %v3221_v3 = vld [vmem:[#allocation5 + $0x8] ss:$48 sps:$4 sm:$0xff]   ;;  %1940 = vmatprep.subr.bf16.mxu1 %v3218_v1  ;;  %v3222_v4 = vld [vmem:[#allocation5 + $0x64] ss:$48 sps:$4 sm:$0xff]  }
  0x73   :  { %1859 = vmatpush1.bf16.msra.mxu0 %v3220_v2  ;;  %1941 = vmatpush1.bf16.msra.mxu1 %v3221_v3  ;;  %v3224_v5 = vld [vmem:[#allocation5 + $0x6c] ss:$48 sps:$4 sm:$0xff]   ;;  %v3226_v6 = vld [vmem:[#allocation5 + $0x60] ss:$48 sps:$4 sm:$0xff]   ;;  %v3227_v7 = vld [vmem:[#allocation5 + $0x68] ss:$48 sps:$4 sm:$0xff]  }
  0x74   :  { %1860 = vmatprep.subr.bf16.mxu0 %v3222_v4  ;;  %1942 = vmatprep.subr.bf16.mxu1 %v3224_v5  ;;  %v3228_v8 = vld [vmem:[#allocation5 + $0xc4] ss:$48 sps:$4 sm:$0xff]   ;;  %v3230_v9 = vld [vmem:[#allocation5 + $0xcc] ss:$48 sps:$4 sm:$0xff]   ;;  %v3232_v10 = vld [vmem:[#allocation5 + $0xc0] ss:$48 sps:$4 sm:$0xff]  }
  0x75   :  { %v3233_v11 = vld [vmem:[#allocation5 + $0xc8] ss:$48 sps:$4 sm:$0xff]   ;;  %v3234_v12 = vld [vmem:[#allocation5 + $0x124] ss:$48 sps:$4 sm:$0xff]   ;;  %v3236_v13 = vld [vmem:[#allocation5 + $0x12c] ss:$48 sps:$4 sm:$0xff]  }
  0x76   :  { %v3238_v14 = vld [vmem:[#allocation5 + $0x120] ss:$48 sps:$4 sm:$0xff]   ;;  %v3239_v15 = vld [vmem:[#allocation5 + $0x128] ss:$48 sps:$4 sm:$0xff]   ;;  %v3240_v16 = vld [vmem:[#allocation5 + $0x184] ss:$48 sps:$4 sm:$0xff]  }
  0x77   :  { %1861 = vmatpush1.bf16.msra.mxu0 %v3226_v6  ;;  %1943 = vmatpush1.bf16.msra.mxu1 %v3227_v7  ;;  %v3242_v17 = vld [vmem:[#allocation5 + $0x18c] ss:$48 sps:$4 sm:$0xff]   ;;  %v3244_v18 = vld [vmem:[#allocation5 + $0x180] ss:$48 sps:$4 sm:$0xff]   ;;  %v3245_v19 = vld [vmem:[#allocation5 + $0x188] ss:$48 sps:$4 sm:$0xff]  }
  0x78   :  { %1862 = vmatprep.subr.bf16.mxu0 %v3228_v8  ;;  %1944 = vmatprep.subr.bf16.mxu1 %v3230_v9  ;;  %v3246_v20 = vld [vmem:[#allocation5 + $0x1e4] ss:$48 sps:$4 sm:$0xff]   ;;  %v3248_v21 = vld [vmem:[#allocation5 + $0x1ec] ss:$48 sps:$4 sm:$0xff]   ;;  %v3250_v22 = vld [vmem:[#allocation5 + $0x1e0] ss:$48 sps:$4 sm:$0xff]  }
  0x79   :  { %v3251_v23 = vld [vmem:[#allocation5 + $0x1e8] ss:$48 sps:$4 sm:$0xff]   ;;  %v3252_v24 = vld [vmem:[#allocation5 + $0x244] ss:$48 sps:$4 sm:$0xff]   ;;  %v3254_v25 = vld [vmem:[#allocation5 + $0x24c] ss:$48 sps:$4 sm:$0xff]  }
  0x7a   :  { %v3256_v26 = vld [vmem:[#allocation5 + $0x240] ss:$48 sps:$4 sm:$0xff]   ;;  %v3257_v27 = vld [vmem:[#allocation5 + $0x248] ss:$48 sps:$4 sm:$0xff]   ;;  %v3258_v28 = vld [vmem:[#allocation5 + $0x2a4] ss:$48 sps:$4 sm:$0xff]  }
  0x7b   :  { %1863 = vmatpush1.bf16.msra.mxu0 %v3232_v10  ;;  %1945 = vmatpush1.bf16.msra.mxu1 %v3233_v11  ;;  %v3260_v29 = vld [vmem:[#allocation5 + $0x2ac] ss:$48 sps:$4 sm:$0xff]   ;;  %v3262_v30 = vld [vmem:[#allocation5 + $0x2a0] ss:$48 sps:$4 sm:$0xff]   ;;  %v3263_v31 = vld [vmem:[#allocation5 + $0x2a8] ss:$48 sps:$4 sm:$0xff]  }
  0x7c   :  { %1864 = vmatprep.subr.bf16.mxu0 %v3234_v12  ;;  %1946 = vmatprep.subr.bf16.mxu1 %v3236_v13  ;;  %v3264_v32 = vld [vmem:[#allocation5 + $0x304] ss:$48 sps:$4 sm:$0xff]   ;;  %v3266_v33 = vld [vmem:[#allocation5 + $0x30c] ss:$48 sps:$4 sm:$0xff]   ;;  %v3268_v34 = vld [vmem:[#allocation5 + $0x300] ss:$48 sps:$4 sm:$0xff]  }
  0x7d   :  { %v3269_v35 = vld [vmem:[#allocation5 + $0x308] ss:$48 sps:$4 sm:$0xff]   ;;  %v3270_v36 = vld [vmem:[#allocation5 + $0x364] ss:$48 sps:$4 sm:$0xff]   ;;  %v3272_v37 = vld [vmem:[#allocation5 + $0x36c] ss:$48 sps:$4 sm:$0xff]  }
  0x7e   :  { %v3856_v38 = vmov 1966171168   ;;  %v3274_v41 = vld [vmem:[#allocation5 + $0x360] ss:$48 sps:$4 sm:$0xff]   ;;  %v3275_v42 = vld [vmem:[#allocation5 + $0x368] ss:$48 sps:$4 sm:$0xff]  }
  0x7f   :  { %1865 = vmatpush1.bf16.msra.mxu0 %v3238_v14  ;;  %1947 = vmatpush1.bf16.msra.mxu1 %v3239_v15  ;;  %v401_v39 = vunpack.c.l.s4 %v3856_v38  ;;  %v3276_v43 = vld [vmem:[#allocation5 + $0x3c4] ss:$48 sps:$4 sm:$0xff]   ;;  %v3278_v44 = vld [vmem:[#allocation5 + $0x3cc] ss:$48 sps:$4 sm:$0xff]   ;;  %v3976_v46 = vshrl.u32 %v403_v40, 7  ;;  %vm3859_vm0 = vmmov 0  }
  0x80   :  { %1866 = vmatprep.subr.bf16.mxu0 %v3240_v16  ;;  %1948 = vmatprep.subr.bf16.mxu1 %v3242_v17  ;;  %v3280_v47 = vld [vmem:[#allocation5 + $0x3c0] ss:$48 sps:$4 sm:$0xff]   ;;  %v3281_v48 = vld [vmem:[#allocation5 + $0x3c8] ss:$48 sps:$4 sm:$0xff]   ;;  %v3282_v49 = vld [vmem:[#allocation5 + $0x424] ss:$48 sps:$4 sm:$0xff]  }
  0x81   :  { %v402_v45 = vunpack.c.0.s8 %v401_v39  ;;  %v3284_v50 = vld [vmem:[#allocation5 + $0x42c] ss:$48 sps:$4 sm:$0xff]   ;;  %v3286_v53 = vld [vmem:[#allocation5 + $0x420] ss:$48 sps:$4 sm:$0xff]   ;;  %v3287_v54 = vld [vmem:[#allocation5 + $0x428] ss:$48 sps:$4 sm:$0xff]  }
  0x82   :  { %v2792_v52 = vld.sshfl [vmem:[#allocation2] sm:$0x13 pattern:$0x75316420]  ;;  %v3288_v56 = vld [vmem:[#allocation5 + $0x484] ss:$48 sps:$4 sm:$0xff]  }
  0x83   :  { %1867 = vmatpush1.bf16.msra.mxu0 %v3244_v18  ;;  %1949 = vmatpush1.bf16.msra.mxu1 %v3245_v19  ;;  %v405_v51 = vsub.s32 %v402_v45, %v3976_v46  ;;  %v399_v55 = vcombine.high %v2792_v52, %v2792_v52  ;;  %v3290_v57 = vld [vmem:[#allocation5 + $0x48c] ss:$48 sps:$4 sm:$0xff]   ;;  %v3292_v59 = vld [vmem:[#allocation5 + $0x480] ss:$48 sps:$4 sm:$0xff]   ;;  %v3293_v60 = vld [vmem:[#allocation5 + $0x488] ss:$48 sps:$4 sm:$0xff]  }
  0x84   :  { %1868 = vmatprep.subr.bf16.mxu0 %v3246_v20  ;;  %1950 = vmatprep.subr.bf16.mxu1 %v3248_v21  ;;  %v3294_v61 = vld [vmem:[#allocation5 + $0x4e4] ss:$48 sps:$4 sm:$0xff]   ;;  %v3296_v62 = vld [vmem:[#allocation5 + $0x4ec] ss:$48 sps:$4 sm:$0xff]   ;;  %v3298_v63 = vld [vmem:[#allocation5 + $0x4e0] ss:$48 sps:$4 sm:$0xff]  }
  0x85   :  { %v3979_v58 = vrot.slane %v399_v55, %v405_v51  ;;  %v3299_v0 = vld [vmem:[#allocation5 + $0x4e8] ss:$48 sps:$4 sm:$0xff]   ;;  %v3300_v1 = vld [vmem:[#allocation5 + $0x544] ss:$48 sps:$4 sm:$0xff]   ;;  %v3302_v2 = vld [vmem:[#allocation5 + $0x54c] ss:$48 sps:$4 sm:$0xff]   ;;  %v3983_v11 = vrot.slane %v2792_v52, %v405_v51 }
  0x86   :  { %v3304_v3 = vld [vmem:[#allocation5 + $0x540] ss:$48 sps:$4 sm:$0xff]   ;;  %v3305_v4 = vld [vmem:[#allocation5 + $0x548] ss:$48 sps:$4 sm:$0xff]   ;;  %v3306_v5 = vld [vmem:[#allocation5 + $0x5a4] ss:$48 sps:$4 sm:$0xff]  }
  0x87   :  { %1869 = vmatpush1.bf16.msra.mxu0 %v3250_v22  ;;  %1951 = vmatpush1.bf16.msra.mxu1 %v3251_v23  ;;  %v3308_v6 = vld [vmem:[#allocation5 + $0x5ac] ss:$48 sps:$4 sm:$0xff]   ;;  %v3310_v7 = vld [vmem:[#allocation5 + $0x5a0] ss:$48 sps:$4 sm:$0xff]   ;;  %v3311_v8 = vld [vmem:[#allocation5 + $0x5a8] ss:$48 sps:$4 sm:$0xff]   ;;  %v3991_v45 = vcombine.high %v3983_v11, %v3983_v11 }
  0x88   :  { %1870 = vmatprep.subr.bf16.mxu0 %v3252_v24  ;;  %1952 = vmatprep.subr.bf16.mxu1 %v3254_v25  ;;  %v3314_v9 = vld [vmem:[#allocation5 + $0x604] ss:$48 sps:$4 sm:$0xff]   ;;  %v3317_v10 = vld [vmem:[#allocation5 + $0x60c] ss:$48 sps:$4 sm:$0xff]   ;;  %v3312_v12 = vld [vmem:[#allocation5 + $0x600] ss:$48 sps:$4 sm:$0xff]  }
  0x89   :  { %1890 = vmatprep.mubr.bf16.mxu0 %v3979_v58  ;;  %1972 = vmatprep.mubr.bf16.mxu1 %v3979_v58  ;;  %v3315_v13 = vld [vmem:[#allocation5 + $0x608] ss:$48 sps:$4 sm:$0xff]   ;;  %v3320_v14 = vld [vmem:[#allocation5 + $0x664] ss:$48 sps:$4 sm:$0xff]   ;;  %v3323_v15 = vld [vmem:[#allocation5 + $0x66c] ss:$48 sps:$4 sm:$0xff]  }
  0x8a   :  { %v3318_v16 = vld [vmem:[#allocation5 + $0x660] ss:$48 sps:$4 sm:$0xff]   ;;  %v3321_v17 = vld [vmem:[#allocation5 + $0x668] ss:$48 sps:$4 sm:$0xff]   ;;  %v3326_v18 = vld [vmem:[#allocation5 + $0x6c4] ss:$48 sps:$4 sm:$0xff]  }
  0x8b   :  { %1871 = vmatpush1.bf16.msra.mxu0 %v3256_v26  ;;  %1953 = vmatpush1.bf16.msra.mxu1 %v3257_v27  ;;  %v3329_v19 = vld [vmem:[#allocation5 + $0x6cc] ss:$48 sps:$4 sm:$0xff]   ;;  %v3857_v20 = vmov 0   ;;  %v3324_v21 = vld [vmem:[#allocation5 + $0x6c0] ss:$48 sps:$4 sm:$0xff]   ;;  %s3860_s6 = smov 96  }
  0x8c   :  { %1872 = vmatprep.subr.bf16.mxu0 %v3258_v28  ;;  %1954 = vmatprep.subr.bf16.mxu1 %v3260_v29  ;;  %v3327_v22 = vld [vmem:[#allocation5 + $0x6c8] ss:$48 sps:$4 sm:$0xff]   ;;  %v3332_v23 = vld [vmem:[#allocation5 + $0x724] ss:$48 sps:$4 sm:$0xff]   ;;  %v3335_v24 = vld [vmem:[#allocation5 + $0x72c] ss:$48 sps:$4 sm:$0xff]  }
  0x8d   :  { %v3330_v25 = vld [vmem:[#allocation5 + $0x720] ss:$48 sps:$4 sm:$0xff]   ;;  %v3333_v26 = vld [vmem:[#allocation5 + $0x728] ss:$48 sps:$4 sm:$0xff]   ;;  %v3338_v27 = vld [vmem:[#allocation5 + $0x784] ss:$48 sps:$4 sm:$0xff]  }
  0x8e   :  { %v3341_v28 = vld [vmem:[#allocation5 + $0x78c] ss:$48 sps:$4 sm:$0xff]   ;;  %v3336_v29 = vld [vmem:[#allocation5 + $0x780] ss:$48 sps:$4 sm:$0xff]   ;;  %v3351_v38 = vld [vmem:[#allocation5 + $0x848] ss:$48 sps:$4 sm:$0xff]  }
  0x8f   :  { %1873 = vmatpush1.bf16.msra.mxu0 %v3262_v30  ;;  %1955 = vmatpush1.bf16.msra.mxu1 %v3263_v31  ;;  %v3339_v30 = vld [vmem:[#allocation5 + $0x788] ss:$48 sps:$4 sm:$0xff]   ;;  %v3344_v31 = vld [vmem:[#allocation5 + $0x7e4] ss:$48 sps:$4 sm:$0xff]   ;;  %v3359_v40 = vld [vmem:[#allocation5 + $0x8ac] ss:$48 sps:$4 sm:$0xff]  }
  0x90   :  { %1874 = vmatprep.subr.bf16.mxu0 %v3264_v32  ;;  %1956 = vmatprep.subr.bf16.mxu1 %v3266_v33  ;;  %v3347_v32 = vld [vmem:[#allocation5 + $0x7ec] ss:$48 sps:$4 sm:$0xff]   ;;  %v3342_v33 = vld [vmem:[#allocation5 + $0x7e0] ss:$48 sps:$4 sm:$0xff]   ;;  %v3356_v39 = vld [vmem:[#allocation5 + $0x8a4] ss:$48 sps:$4 sm:$0xff]  }
  0x91   :  { %v3366_v51 = vld [vmem:[#allocation5 + $0x70] ss:$48 sps:$4 sm:$0xff]   ;;  %v3369_v52 = vld [vmem:[#allocation5 + $0x78] ss:$48 sps:$4 sm:$0xff]   ;;  %vm2728_vm5 = vcmask 261120   ;;  %vm2772_vm6 = vcmask 156672  }
  0x92   :  { %v3372_v55 = vld [vmem:[#allocation5 + $0xd0] ss:$48 sps:$4 sm:$0xff]  }
  0x93   :  { %1875 = vmatpush1.bf16.msra.mxu0 %v3268_v34  ;;  %1957 = vmatpush1.bf16.msra.mxu1 %v3269_v35  ;;  %v3345_v34 = vld [vmem:[#allocation5 + $0x7e8] ss:$48 sps:$4 sm:$0xff]   ;;  %v3350_v35 = vld [vmem:[#allocation5 + $0x844] ss:$48 sps:$4 sm:$0xff]  }
  0x94   :  { %1876 = vmatprep.subr.bf16.mxu0 %v3270_v36  ;;  %1958 = vmatprep.subr.bf16.mxu1 %v3272_v37  ;;  %v3353_v36 = vld [vmem:[#allocation5 + $0x84c] ss:$48 sps:$4 sm:$0xff]   ;;  %v3348_v37 = vld [vmem:[#allocation5 + $0x840] ss:$48 sps:$4 sm:$0xff]  }
  0x97   :  { %1877 = vmatpush1.bf16.msra.mxu0 %v3274_v41  ;;  %1959 = vmatpush1.bf16.msra.mxu1 %v3275_v42  ;;  %v3354_v41 = vld [vmem:[#allocation5 + $0x8a0] ss:$48 sps:$4 sm:$0xff]   ;;  %v3357_v42 = vld [vmem:[#allocation5 + $0x8a8] ss:$48 sps:$4 sm:$0xff]  }
  0x98   :  { %1878 = vmatprep.subr.bf16.mxu0 %v3276_v43  ;;  %1960 = vmatprep.subr.bf16.mxu1 %v3278_v44  ;;  %v3362_v43 = vld [vmem:[#allocation5 + $0x14] ss:$48 sps:$4 sm:$0xff]   ;;  %v3365_v44 = vld [vmem:[#allocation5 + $0x1c] ss:$48 sps:$4 sm:$0xff]  }
  0x9b   :  { %1879 = vmatpush1.bf16.msra.mxu0 %v3280_v47  ;;  %1961 = vmatpush1.bf16.msra.mxu1 %v3281_v48  ;;  %v3360_v47 = vld [vmem:[#allocation5 + $0x10] ss:$48 sps:$4 sm:$0xff]   ;;  %v3363_v48 = vld [vmem:[#allocation5 + $0x18] ss:$48 sps:$4 sm:$0xff]  }
  0x9c   :  { %1880 = vmatprep.subr.bf16.mxu0 %v3282_v49  ;;  %1962 = vmatprep.subr.bf16.mxu1 %v3284_v50  ;;  %v3368_v49 = vld [vmem:[#allocation5 + $0x74] ss:$48 sps:$4 sm:$0xff]   ;;  %v3371_v50 = vld [vmem:[#allocation5 + $0x7c] ss:$48 sps:$4 sm:$0xff]  }
  0x9f   :  { %1881 = vmatpush1.bf16.msra.mxu0 %v3286_v53  ;;  %1963 = vmatpush1.bf16.msra.mxu1 %v3287_v54  ;;  %v3374_v53 = vld [vmem:[#allocation5 + $0xd4] ss:$48 sps:$4 sm:$0xff]   ;;  %v3377_v54 = vld [vmem:[#allocation5 + $0xdc] ss:$48 sps:$4 sm:$0xff]  }
  0xa0   :  { %1882 = vmatprep.subr.bf16.mxu0 %v3288_v56  ;;  %1964 = vmatprep.subr.bf16.mxu1 %v3290_v57  ;;  %v3375_v56 = vld [vmem:[#allocation5 + $0xd8] ss:$48 sps:$4 sm:$0xff]   ;;  %v3380_v57 = vld [vmem:[#allocation5 + $0x134] ss:$48 sps:$4 sm:$0xff]  }
  0xa3   :  { %1883 = vmatpush1.bf16.msra.mxu0 %v3292_v59  ;;  %1965 = vmatpush1.bf16.msra.mxu1 %v3293_v60  ;;  %v3383_v59 = vld [vmem:[#allocation5 + $0x13c] ss:$48 sps:$4 sm:$0xff]   ;;  %v3378_v60 = vld [vmem:[#allocation5 + $0x130] ss:$48 sps:$4 sm:$0xff]  }
  0xa4   :  { %1884 = vmatprep.subr.bf16.mxu0 %v3294_v61  ;;  %1966 = vmatprep.subr.bf16.mxu1 %v3296_v62  ;;  %v3381_v61 = vld [vmem:[#allocation5 + $0x138] ss:$48 sps:$4 sm:$0xff]   ;;  %v3386_v62 = vld [vmem:[#allocation5 + $0x194] ss:$48 sps:$4 sm:$0xff]  }
  0xa7   :  { %1885 = vmatpush1.bf16.msra.mxu0 %v3298_v63  ;;  %1967 = vmatpush1.bf16.msra.mxu1 %v3299_v0  ;;  %v3389_v63 = vld [vmem:[#allocation5 + $0x19c] ss:$48 sps:$4 sm:$0xff]   ;;  %v3384_v0 = vld [vmem:[#allocation5 + $0x190] ss:$48 sps:$4 sm:$0xff]  }
  0xa8   :  { %1886 = vmatprep.subr.bf16.mxu0 %v3300_v1  ;;  %1968 = vmatprep.subr.bf16.mxu1 %v3302_v2  ;;  %v3387_v1 = vld [vmem:[#allocation5 + $0x198] ss:$48 sps:$4 sm:$0xff]   ;;  %v3392_v2 = vld [vmem:[#allocation5 + $0x1f4] ss:$48 sps:$4 sm:$0xff]  }
  0xab   :  { %1887 = vmatpush1.bf16.msra.mxu0 %v3304_v3  ;;  %1969 = vmatpush1.bf16.msra.mxu1 %v3305_v4  ;;  %v3395_v3 = vld [vmem:[#allocation5 + $0x1fc] ss:$48 sps:$4 sm:$0xff]   ;;  %v3390_v4 = vld [vmem:[#allocation5 + $0x1f0] ss:$48 sps:$4 sm:$0xff]  }
  0xac   :  { %1888 = vmatprep.subr.bf16.mxu0 %v3306_v5  ;;  %1970 = vmatprep.subr.bf16.mxu1 %v3308_v6  ;;  %v3393_v5 = vld [vmem:[#allocation5 + $0x1f8] ss:$48 sps:$4 sm:$0xff]   ;;  %v3398_v6 = vld [vmem:[#allocation5 + $0x254] ss:$48 sps:$4 sm:$0xff]  }
  0xaf   :  { %1889 = vmatpush1.bf16.msra.mxu0 %v3310_v7  ;;  %1971 = vmatpush1.bf16.msra.mxu1 %v3311_v8  ;;  %v3401_v7 = vld [vmem:[#allocation5 + $0x25c] ss:$48 sps:$4 sm:$0xff]   ;;  %v3396_v8 = vld [vmem:[#allocation5 + $0x250] ss:$48 sps:$4 sm:$0xff]  }
  0xb0   :  { %1899 = vmatprep.subr.bf16.mxu0 %v3314_v9  ;;  %1981 = vmatprep.subr.bf16.mxu1 %v3317_v10  ;;  %v3399_v9 = vld [vmem:[#allocation5 + $0x258] ss:$48 sps:$4 sm:$0xff]   ;;  %v3404_v10 = vld [vmem:[#allocation5 + $0x2b4] ss:$48 sps:$4 sm:$0xff]  }
  0xb2   :  { %1891 = vmatmul.mubr.bf16.vlgmr.msra.gmra.mrb[0].mxu0 %v3983_v11  ;;  %1973 = vmatmul.mubr.bf16.vlgmr.msra.gmra.mrb[0].mxu1 %v3983_v11 }
  0xb3   :  { %1900 = vmatpush1.bf16.msra.mxu0 %v3312_v12  ;;  %1982 = vmatpush1.bf16.msra.mxu1 %v3315_v13  ;;  %v3407_v12 = vld [vmem:[#allocation5 + $0x2bc] ss:$48 sps:$4 sm:$0xff]   ;;  %v3402_v13 = vld [vmem:[#allocation5 + $0x2b0] ss:$48 sps:$4 sm:$0xff]  }
  0xb4   :  { %1901 = vmatprep.subr.bf16.mxu0 %v3320_v14  ;;  %1983 = vmatprep.subr.bf16.mxu1 %v3323_v15  ;;  %v3405_v14 = vld [vmem:[#allocation5 + $0x2b8] ss:$48 sps:$4 sm:$0xff]   ;;  %v3410_v15 = vld [vmem:[#allocation5 + $0x314] ss:$48 sps:$4 sm:$0xff]  }
  0xb5   :  { %1931 = vmatprep.mubr.bf16.mxu0 %v3857_v20  ;;  %2013 = vmatprep.mubr.bf16.mxu1 %v3857_v20 }
  0xb7   :  { %1902 = vmatpush1.bf16.msra.mxu0 %v3318_v16  ;;  %1984 = vmatpush1.bf16.msra.mxu1 %v3321_v17  ;;  %v3413_v16 = vld [vmem:[#allocation5 + $0x31c] ss:$48 sps:$4 sm:$0xff]   ;;  %v3408_v17 = vld [vmem:[#allocation5 + $0x310] ss:$48 sps:$4 sm:$0xff]  }
  0xb8   :  { %1903 = vmatprep.subr.bf16.mxu0 %v3326_v18  ;;  %1985 = vmatprep.subr.bf16.mxu1 %v3329_v19  ;;  %v3411_v18 = vld [vmem:[#allocation5 + $0x318] ss:$48 sps:$4 sm:$0xff]   ;;  %v3416_v19 = vld [vmem:[#allocation5 + $0x374] ss:$48 sps:$4 sm:$0xff]  }
  0xbb   :  { %1904 = vmatpush1.bf16.msra.mxu0 %v3324_v21  ;;  %1986 = vmatpush1.bf16.msra.mxu1 %v3327_v22  ;;  %v3419_v21 = vld [vmem:[#allocation5 + $0x37c] ss:$48 sps:$4 sm:$0xff]   ;;  %v3414_v22 = vld [vmem:[#allocation5 + $0x370] ss:$48 sps:$4 sm:$0xff]  }
  0xbc   :  { %1905 = vmatprep.subr.bf16.mxu0 %v3332_v23  ;;  %1987 = vmatprep.subr.bf16.mxu1 %v3335_v24  ;;  %v3417_v23 = vld [vmem:[#allocation5 + $0x378] ss:$48 sps:$4 sm:$0xff]   ;;  %v3422_v24 = vld [vmem:[#allocation5 + $0x3d4] ss:$48 sps:$4 sm:$0xff]  }
  0xbf   :  { %1906 = vmatpush1.bf16.msra.mxu0 %v3330_v25  ;;  %1988 = vmatpush1.bf16.msra.mxu1 %v3333_v26  ;;  %v3425_v25 = vld [vmem:[#allocation5 + $0x3dc] ss:$48 sps:$4 sm:$0xff]   ;;  %v3420_v26 = vld [vmem:[#allocation5 + $0x3d0] ss:$48 sps:$4 sm:$0xff]  }
  0xc0   :  { %1907 = vmatprep.subr.bf16.mxu0 %v3338_v27  ;;  %1989 = vmatprep.subr.bf16.mxu1 %v3341_v28  ;;  %v3423_v27 = vld [vmem:[#allocation5 + $0x3d8] ss:$48 sps:$4 sm:$0xff]   ;;  %v3428_v28 = vld [vmem:[#allocation5 + $0x434] ss:$48 sps:$4 sm:$0xff]  }
  0xc3   :  { %1908 = vmatpush1.bf16.msra.mxu0 %v3336_v29  ;;  %1990 = vmatpush1.bf16.msra.mxu1 %v3339_v30  ;;  %v3431_v29 = vld [vmem:[#allocation5 + $0x43c] ss:$48 sps:$4 sm:$0xff]   ;;  %v3426_v30 = vld [vmem:[#allocation5 + $0x430] ss:$48 sps:$4 sm:$0xff]  }
  0xc4   :  { %1909 = vmatprep.subr.bf16.mxu0 %v3344_v31  ;;  %1991 = vmatprep.subr.bf16.mxu1 %v3347_v32  ;;  %v3429_v31 = vld [vmem:[#allocation5 + $0x438] ss:$48 sps:$4 sm:$0xff]   ;;  %v3434_v32 = vld [vmem:[#allocation5 + $0x494] ss:$48 sps:$4 sm:$0xff]  }
  0xc7   :  { %1910 = vmatpush1.bf16.msra.mxu0 %v3342_v33  ;;  %1992 = vmatpush1.bf16.msra.mxu1 %v3345_v34  ;;  %v3437_v33 = vld [vmem:[#allocation5 + $0x49c] ss:$48 sps:$4 sm:$0xff]   ;;  %v3432_v34 = vld [vmem:[#allocation5 + $0x490] ss:$48 sps:$4 sm:$0xff]  }
  0xc8   :  { %1911 = vmatprep.subr.bf16.mxu0 %v3350_v35  ;;  %1993 = vmatprep.subr.bf16.mxu1 %v3353_v36  ;;  %v3435_v35 = vld [vmem:[#allocation5 + $0x498] ss:$48 sps:$4 sm:$0xff]   ;;  %v3440_v36 = vld [vmem:[#allocation5 + $0x4f4] ss:$48 sps:$4 sm:$0xff]  }
  0xcb   :  { %1912 = vmatpush1.bf16.msra.mxu0 %v3348_v37  ;;  %1994 = vmatpush1.bf16.msra.mxu1 %v3351_v38  ;;  %v3443_v37 = vld [vmem:[#allocation5 + $0x4fc] ss:$48 sps:$4 sm:$0xff]   ;;  %v3438_v38 = vld [vmem:[#allocation5 + $0x4f0] ss:$48 sps:$4 sm:$0xff]  }
  0xcc   :  { %1913 = vmatprep.subr.bf16.mxu0 %v3356_v39  ;;  %1995 = vmatprep.subr.bf16.mxu1 %v3359_v40  ;;  %v3441_v39 = vld [vmem:[#allocation5 + $0x4f8] ss:$48 sps:$4 sm:$0xff]   ;;  %v3446_v40 = vld [vmem:[#allocation5 + $0x554] ss:$48 sps:$4 sm:$0xff]  }
  0xcf   :  { %1914 = vmatpush1.bf16.msra.mxu0 %v3354_v41  ;;  %1996 = vmatpush1.bf16.msra.mxu1 %v3357_v42  ;;  %v3449_v41 = vld [vmem:[#allocation5 + $0x55c] ss:$48 sps:$4 sm:$0xff]   ;;  %v3444_v42 = vld [vmem:[#allocation5 + $0x550] ss:$48 sps:$4 sm:$0xff]  }
  0xd0   :  { %2022 = vmatprep.subr.bf16.mxu0 %v3362_v43  ;;  %2104 = vmatprep.subr.bf16.mxu1 %v3365_v44  ;;  %v3447_v43 = vld [vmem:[#allocation5 + $0x558] ss:$48 sps:$4 sm:$0xff]   ;;  %v3452_v44 = vld [vmem:[#allocation5 + $0x5b4] ss:$48 sps:$4 sm:$0xff]  }
  0xd2   :  { %1932 = vmatmul.mubr.bf16.vlgmr.msra.gmra.mrb[0].mxu0 %v3991_v45  ;;  %2014 = vmatmul.mubr.bf16.vlgmr.msra.gmra.mrb[0].mxu1 %v3991_v45 }
  0xd3   :  { %2023 = vmatpush1.bf16.msra.mxu0 %v3360_v47  ;;  %2105 = vmatpush1.bf16.msra.mxu1 %v3363_v48  ;;  %v3455_v47 = vld [vmem:[#allocation5 + $0x5bc] ss:$48 sps:$4 sm:$0xff]   ;;  %v3450_v48 = vld [vmem:[#allocation5 + $0x5b0] ss:$48 sps:$4 sm:$0xff]  }
  0xd4   :  { %2024 = vmatprep.subr.bf16.mxu0 %v3368_v49  ;;  %2106 = vmatprep.subr.bf16.mxu1 %v3371_v50  ;;  %v3453_v49 = vld [vmem:[#allocation5 + $0x5b8] ss:$48 sps:$4 sm:$0xff]   ;;  %v3458_v50 = vld [vmem:[#allocation5 + $0x614] ss:$48 sps:$4 sm:$0xff]  }
  0xd5   :  { %2054 = vmatprep.mubr.bf16.mxu0 %v3979_v58  ;;  %2136 = vmatprep.mubr.bf16.mxu1 %v3979_v58 }
  0xd7   :  { %2025 = vmatpush1.bf16.msra.mxu0 %v3366_v51  ;;  %2107 = vmatpush1.bf16.msra.mxu1 %v3369_v52  ;;  %v3461_v51 = vld [vmem:[#allocation5 + $0x61c] ss:$48 sps:$4 sm:$0xff]   ;;  %v3456_v52 = vld [vmem:[#allocation5 + $0x610] ss:$48 sps:$4 sm:$0xff]  }
  0xd8   :  { %2026 = vmatprep.subr.bf16.mxu0 %v3374_v53  ;;  %2108 = vmatprep.subr.bf16.mxu1 %v3377_v54  ;;  %v3459_v53 = vld [vmem:[#allocation5 + $0x618] ss:$48 sps:$4 sm:$0xff]   ;;  %v3464_v54 = vld [vmem:[#allocation5 + $0x674] ss:$48 sps:$4 sm:$0xff]  }
  0xdb   :  { %2027 = vmatpush1.bf16.msra.mxu0 %v3372_v55  ;;  %2109 = vmatpush1.bf16.msra.mxu1 %v3375_v56  ;;  %v3467_v55 = vld [vmem:[#allocation5 + $0x67c] ss:$48 sps:$4 sm:$0xff]   ;;  %v3462_v56 = vld [vmem:[#allocation5 + $0x670] ss:$48 sps:$4 sm:$0xff]  }
  0xdc   :  { %2028 = vmatprep.subr.bf16.mxu0 %v3380_v57  ;;  %2110 = vmatprep.subr.bf16.mxu1 %v3383_v59  ;;  %v3465_v57 = vld [vmem:[#allocation5 + $0x678] ss:$48 sps:$4 sm:$0xff]   ;;  %v3470_v59 = vld [vmem:[#allocation5 + $0x6d4] ss:$48 sps:$4 sm:$0xff]  }
  0xdf   :  { %2029 = vmatpush1.bf16.msra.mxu0 %v3378_v60  ;;  %2111 = vmatpush1.bf16.msra.mxu1 %v3381_v61  ;;  %v3473_v60 = vld [vmem:[#allocation5 + $0x6dc] ss:$48 sps:$4 sm:$0xff]   ;;  %v3468_v61 = vld [vmem:[#allocation5 + $0x6d0] ss:$48 sps:$4 sm:$0xff]  }
  0xe0   :  { %2030 = vmatprep.subr.bf16.mxu0 %v3386_v62  ;;  %2112 = vmatprep.subr.bf16.mxu1 %v3389_v63  ;;  %v3471_v62 = vld [vmem:[#allocation5 + $0x6d8] ss:$48 sps:$4 sm:$0xff]   ;;  %v3476_v63 = vld [vmem:[#allocation5 + $0x734] ss:$48 sps:$4 sm:$0xff]  }
  0xe3   :  { %2031 = vmatpush1.bf16.msra.mxu0 %v3384_v0  ;;  %2113 = vmatpush1.bf16.msra.mxu1 %v3387_v1  ;;  %v3479_v0 = vld [vmem:[#allocation5 + $0x73c] ss:$48 sps:$4 sm:$0xff]   ;;  %v3474_v1 = vld [vmem:[#allocation5 + $0x730] ss:$48 sps:$4 sm:$0xff]  }
  0xe4   :  { %2032 = vmatprep.subr.bf16.mxu0 %v3392_v2  ;;  %2114 = vmatprep.subr.bf16.mxu1 %v3395_v3  ;;  %v3477_v2 = vld [vmem:[#allocation5 + $0x738] ss:$48 sps:$4 sm:$0xff]   ;;  %v3482_v3 = vld [vmem:[#allocation5 + $0x794] ss:$48 sps:$4 sm:$0xff]  }
  0xe7   :  { %2033 = vmatpush1.bf16.msra.mxu0 %v3390_v4  ;;  %2115 = vmatpush1.bf16.msra.mxu1 %v3393_v5  ;;  %v3485_v4 = vld [vmem:[#allocation5 + $0x79c] ss:$48 sps:$4 sm:$0xff]   ;;  %v3480_v5 = vld [vmem:[#allocation5 + $0x790] ss:$48 sps:$4 sm:$0xff]  }
  0xe8   :  { %2034 = vmatprep.subr.bf16.mxu0 %v3398_v6  ;;  %2116 = vmatprep.subr.bf16.mxu1 %v3401_v7  ;;  %v3483_v6 = vld [vmem:[#allocation5 + $0x798] ss:$48 sps:$4 sm:$0xff]   ;;  %v3488_v7 = vld [vmem:[#allocation5 + $0x7f4] ss:$48 sps:$4 sm:$0xff]  }
  0xeb   :  { %2035 = vmatpush1.bf16.msra.mxu0 %v3396_v8  ;;  %2117 = vmatpush1.bf16.msra.mxu1 %v3399_v9  ;;  %v3491_v8 = vld [vmem:[#allocation5 + $0x7fc] ss:$48 sps:$4 sm:$0xff]   ;;  %v3486_v9 = vld [vmem:[#allocation5 + $0x7f0] ss:$48 sps:$4 sm:$0xff]  }
  0xec   :  { %2036 = vmatprep.subr.bf16.mxu0 %v3404_v10  ;;  %2118 = vmatprep.subr.bf16.mxu1 %v3407_v12  ;;  %v3489_v10 = vld [vmem:[#allocation5 + $0x7f8] ss:$48 sps:$4 sm:$0xff]   ;;  %v3494_v12 = vld [vmem:[#allocation5 + $0x854] ss:$48 sps:$4 sm:$0xff]  }
  0xef   :  { %2037 = vmatpush1.bf16.msra.mxu0 %v3402_v13  ;;  %2119 = vmatpush1.bf16.msra.mxu1 %v3405_v14  ;;  %v3497_v13 = vld [vmem:[#allocation5 + $0x85c] ss:$48 sps:$4 sm:$0xff]   ;;  %v3492_v14 = vld [vmem:[#allocation5 + $0x850] ss:$48 sps:$4 sm:$0xff]  }
  0xf0   :  { %2038 = vmatprep.subr.bf16.mxu0 %v3410_v15  ;;  %2120 = vmatprep.subr.bf16.mxu1 %v3413_v16  ;;  %v3495_v15 = vld [vmem:[#allocation5 + $0x858] ss:$48 sps:$4 sm:$0xff]   ;;  %v3500_v16 = vld [vmem:[#allocation5 + $0x8b4] ss:$48 sps:$4 sm:$0xff]  }
  0xf3   :  { %2039 = vmatpush1.bf16.msra.mxu0 %v3408_v17  ;;  %2121 = vmatpush1.bf16.msra.mxu1 %v3411_v18  ;;  %v3503_v17 = vld [vmem:[#allocation5 + $0x8bc] ss:$48 sps:$4 sm:$0xff]   ;;  %v3498_v18 = vld [vmem:[#allocation5 + $0x8b0] ss:$48 sps:$4 sm:$0xff]  }
  0xf4   :  { %2040 = vmatprep.subr.bf16.mxu0 %v3416_v19  ;;  %2122 = vmatprep.subr.bf16.mxu1 %v3419_v21  ;;  %v3501_v19 = vld [vmem:[#allocation5 + $0x8b8] ss:$48 sps:$4 sm:$0xff]   ;;  %v3506_v21 = vld [vmem:[#allocation5 + $0x24] ss:$48 sps:$4 sm:$0xff]  }
  0xf7   :  { %2041 = vmatpush1.bf16.msra.mxu0 %v3414_v22  ;;  %2123 = vmatpush1.bf16.msra.mxu1 %v3417_v23  ;;  %v3509_v22 = vld [vmem:[#allocation5 + $0x2c] ss:$48 sps:$4 sm:$0xff]   ;;  %v3504_v23 = vld [vmem:[#allocation5 + $0x20] ss:$48 sps:$4 sm:$0xff]  }
  0xf8   :  { %2042 = vmatprep.subr.bf16.mxu0 %v3422_v24  ;;  %2124 = vmatprep.subr.bf16.mxu1 %v3425_v25  ;;  %v3507_v24 = vld [vmem:[#allocation5 + $0x28] ss:$48 sps:$4 sm:$0xff]   ;;  %v3512_v25 = vld [vmem:[#allocation5 + $0x84] ss:$48 sps:$4 sm:$0xff]  }
  0xfb   :  { %2043 = vmatpush1.bf16.msra.mxu0 %v3420_v26  ;;  %2125 = vmatpush1.bf16.msra.mxu1 %v3423_v27  ;;  %v3515_v26 = vld [vmem:[#allocation5 + $0x8c] ss:$48 sps:$4 sm:$0xff]   ;;  %v3510_v27 = vld [vmem:[#allocation5 + $0x80] ss:$48 sps:$4 sm:$0xff]  }
  0xfc   :  { %2044 = vmatprep.subr.bf16.mxu0 %v3428_v28  ;;  %2126 = vmatprep.subr.bf16.mxu1 %v3431_v29  ;;  %v3513_v28 = vld [vmem:[#allocation5 + $0x88] ss:$48 sps:$4 sm:$0xff]   ;;  %v3518_v29 = vld [vmem:[#allocation5 + $0xe4] ss:$48 sps:$4 sm:$0xff]  }
  0xff   :  { %2045 = vmatpush1.bf16.msra.mxu0 %v3426_v30  ;;  %2127 = vmatpush1.bf16.msra.mxu1 %v3429_v31  ;;  %v3521_v30 = vld [vmem:[#allocation5 + $0xec] ss:$48 sps:$4 sm:$0xff]   ;;  %v3516_v31 = vld [vmem:[#allocation5 + $0xe0] ss:$48 sps:$4 sm:$0xff]  }
 0x100   :  { %2046 = vmatprep.subr.bf16.mxu0 %v3434_v32  ;;  %2128 = vmatprep.subr.bf16.mxu1 %v3437_v33  ;;  %v3519_v32 = vld [vmem:[#allocation5 + $0xe8] ss:$48 sps:$4 sm:$0xff]   ;;  %v3524_v33 = vld [vmem:[#allocation5 + $0x144] ss:$48 sps:$4 sm:$0xff]  }
 0x103   :  { %2047 = vmatpush1.bf16.msra.mxu0 %v3432_v34  ;;  %2129 = vmatpush1.bf16.msra.mxu1 %v3435_v35  ;;  %v3527_v34 = vld [vmem:[#allocation5 + $0x14c] ss:$48 sps:$4 sm:$0xff]   ;;  %v3522_v35 = vld [vmem:[#allocation5 + $0x140] ss:$48 sps:$4 sm:$0xff]  }
 0x104   :  { %2048 = vmatprep.subr.bf16.mxu0 %v3440_v36  ;;  %2130 = vmatprep.subr.bf16.mxu1 %v3443_v37  ;;  %v3525_v36 = vld [vmem:[#allocation5 + $0x148] ss:$48 sps:$4 sm:$0xff]   ;;  %v3530_v37 = vld [vmem:[#allocation5 + $0x1a4] ss:$48 sps:$4 sm:$0xff]  }
 0x107   :  { %2049 = vmatpush1.bf16.msra.mxu0 %v3438_v38  ;;  %2131 = vmatpush1.bf16.msra.mxu1 %v3441_v39  ;;  %v3533_v38 = vld [vmem:[#allocation5 + $0x1ac] ss:$48 sps:$4 sm:$0xff]   ;;  %v3528_v39 = vld [vmem:[#allocation5 + $0x1a0] ss:$48 sps:$4 sm:$0xff]  }
 0x108   :  { %2050 = vmatprep.subr.bf16.mxu0 %v3446_v40  ;;  %2132 = vmatprep.subr.bf16.mxu1 %v3449_v41  ;;  %v3531_v40 = vld [vmem:[#allocation5 + $0x1a8] ss:$48 sps:$4 sm:$0xff]   ;;  %v3536_v41 = vld [vmem:[#allocation5 + $0x204] ss:$48 sps:$4 sm:$0xff]  }
 0x10b   :  { %2051 = vmatpush1.bf16.msra.mxu0 %v3444_v42  ;;  %2133 = vmatpush1.bf16.msra.mxu1 %v3447_v43  ;;  %v3534_v42 = vld [vmem:[#allocation5 + $0x200] ss:$48 sps:$4 sm:$0xff]   ;;  %v3537_v43 = vld [vmem:[#allocation5 + $0x208] ss:$48 sps:$4 sm:$0xff]  }
 0x10c   :  { %2052 = vmatprep.subr.bf16.mxu0 %v3452_v44  ;;  %2134 = vmatprep.subr.bf16.mxu1 %v3455_v47  ;;  %v3542_v44 = vld [vmem:[#allocation5 + $0x264] ss:$48 sps:$4 sm:$0xff]   ;;  %v3545_v47 = vld [vmem:[#allocation5 + $0x26c] ss:$48 sps:$4 sm:$0xff]  }
 0x10f   :  { %2053 = vmatpush1.bf16.msra.mxu0 %v3450_v48  ;;  %2135 = vmatpush1.bf16.msra.mxu1 %v3453_v49  ;;  %v3540_v48 = vld [vmem:[#allocation5 + $0x260] ss:$48 sps:$4 sm:$0xff]   ;;  %v3543_v49 = vld [vmem:[#allocation5 + $0x268] ss:$48 sps:$4 sm:$0xff]  }
 0x110   :  { %2063 = vmatprep.subr.bf16.mxu0 %v3458_v50  ;;  %2145 = vmatprep.subr.bf16.mxu1 %v3461_v51  ;;  %v3548_v50 = vld [vmem:[#allocation5 + $0x2c4] ss:$48 sps:$4 sm:$0xff]   ;;  %v3551_v51 = vld [vmem:[#allocation5 + $0x2cc] ss:$48 sps:$4 sm:$0xff]  }
 0x112   :  { %2055 = vmatmul.mubr.bf16.vlgmr.msra.gmra.mrb[4].mxu0 %v3983_v11  ;;  %2137 = vmatmul.mubr.bf16.vlgmr.msra.gmra.mrb[4].mxu1 %v3983_v11 }
 0x113   :  { %2064 = vmatpush1.bf16.msra.mxu0 %v3456_v52  ;;  %2146 = vmatpush1.bf16.msra.mxu1 %v3459_v53  ;;  %v3546_v52 = vld [vmem:[#allocation5 + $0x2c0] ss:$48 sps:$4 sm:$0xff]   ;;  %v3549_v53 = vld [vmem:[#allocation5 + $0x2c8] ss:$48 sps:$4 sm:$0xff]  }
 0x114   :  { %2065 = vmatprep.subr.bf16.mxu0 %v3464_v54  ;;  %2147 = vmatprep.subr.bf16.mxu1 %v3467_v55  ;;  %v3554_v54 = vld [vmem:[#allocation5 + $0x324] ss:$48 sps:$4 sm:$0xff]   ;;  %v3557_v55 = vld [vmem:[#allocation5 + $0x32c] ss:$48 sps:$4 sm:$0xff]  }
 0x115   :  { %2095 = vmatprep.mubr.bf16.mxu0 %v3857_v20  ;;  %2177 = vmatprep.mubr.bf16.mxu1 %v3857_v20 }
 0x117   :  { %2066 = vmatpush1.bf16.msra.mxu0 %v3462_v56  ;;  %2148 = vmatpush1.bf16.msra.mxu1 %v3465_v57  ;;  %v3552_v56 = vld [vmem:[#allocation5 + $0x320] ss:$48 sps:$4 sm:$0xff]   ;;  %v3555_v57 = vld [vmem:[#allocation5 + $0x328] ss:$48 sps:$4 sm:$0xff]  }
 0x118   :  { %2067 = vmatprep.subr.bf16.mxu0 %v3470_v59  ;;  %2149 = vmatprep.subr.bf16.mxu1 %v3473_v60  ;;  %v3560_v59 = vld [vmem:[#allocation5 + $0x384] ss:$48 sps:$4 sm:$0xff]   ;;  %v3563_v60 = vld [vmem:[#allocation5 + $0x38c] ss:$48 sps:$4 sm:$0xff]  }
 0x11b   :  { %2068 = vmatpush1.bf16.msra.mxu0 %v3468_v61  ;;  %2150 = vmatpush1.bf16.msra.mxu1 %v3471_v62  ;;  %v3558_v61 = vld [vmem:[#allocation5 + $0x380] ss:$48 sps:$4 sm:$0xff]   ;;  %v3561_v62 = vld [vmem:[#allocation5 + $0x388] ss:$48 sps:$4 sm:$0xff]  }
 0x11c   :  { %2069 = vmatprep.subr.bf16.mxu0 %v3476_v63  ;;  %2151 = vmatprep.subr.bf16.mxu1 %v3479_v0  ;;  %v3566_v63 = vld [vmem:[#allocation5 + $0x3e4] ss:$48 sps:$4 sm:$0xff]   ;;  %v3569_v0 = vld [vmem:[#allocation5 + $0x3ec] ss:$48 sps:$4 sm:$0xff]  }
 0x11f   :  { %2070 = vmatpush1.bf16.msra.mxu0 %v3474_v1  ;;  %2152 = vmatpush1.bf16.msra.mxu1 %v3477_v2  ;;  %v3564_v1 = vld [vmem:[#allocation5 + $0x3e0] ss:$48 sps:$4 sm:$0xff]   ;;  %v3567_v2 = vld [vmem:[#allocation5 + $0x3e8] ss:$48 sps:$4 sm:$0xff]  }
 0x120   :  { %2071 = vmatprep.subr.bf16.mxu0 %v3482_v3  ;;  %2153 = vmatprep.subr.bf16.mxu1 %v3485_v4  ;;  %v3572_v3 = vld [vmem:[#allocation5 + $0x444] ss:$48 sps:$4 sm:$0xff]   ;;  %v3575_v4 = vld [vmem:[#allocation5 + $0x44c] ss:$48 sps:$4 sm:$0xff]  }
 0x123   :  { %2072 = vmatpush1.bf16.msra.mxu0 %v3480_v5  ;;  %2154 = vmatpush1.bf16.msra.mxu1 %v3483_v6  ;;  %v3570_v5 = vld [vmem:[#allocation5 + $0x440] ss:$48 sps:$4 sm:$0xff]   ;;  %v3573_v6 = vld [vmem:[#allocation5 + $0x448] ss:$48 sps:$4 sm:$0xff]  }
 0x124   :  { %2073 = vmatprep.subr.bf16.mxu0 %v3488_v7  ;;  %2155 = vmatprep.subr.bf16.mxu1 %v3491_v8  ;;  %v3578_v7 = vld [vmem:[#allocation5 + $0x4a4] ss:$48 sps:$4 sm:$0xff]   ;;  %v3581_v8 = vld [vmem:[#allocation5 + $0x4ac] ss:$48 sps:$4 sm:$0xff]  }
 0x127   :  { %2074 = vmatpush1.bf16.msra.mxu0 %v3486_v9  ;;  %2156 = vmatpush1.bf16.msra.mxu1 %v3489_v10  ;;  %v3576_v9 = vld [vmem:[#allocation5 + $0x4a0] ss:$48 sps:$4 sm:$0xff]   ;;  %v3579_v10 = vld [vmem:[#allocation5 + $0x4a8] ss:$48 sps:$4 sm:$0xff]  }
 0x128   :  { %2075 = vmatprep.subr.bf16.mxu0 %v3494_v12  ;;  %2157 = vmatprep.subr.bf16.mxu1 %v3497_v13  ;;  %v3584_v12 = vld [vmem:[#allocation5 + $0x504] ss:$48 sps:$4 sm:$0xff]   ;;  %v3587_v13 = vld [vmem:[#allocation5 + $0x50c] ss:$48 sps:$4 sm:$0xff]  }
 0x12b   :  { %2076 = vmatpush1.bf16.msra.mxu0 %v3492_v14  ;;  %2158 = vmatpush1.bf16.msra.mxu1 %v3495_v15  ;;  %v3582_v14 = vld [vmem:[#allocation5 + $0x500] ss:$48 sps:$4 sm:$0xff]   ;;  %v3585_v15 = vld [vmem:[#allocation5 + $0x508] ss:$48 sps:$4 sm:$0xff]  }
 0x12c   :  { %2077 = vmatprep.subr.bf16.mxu0 %v3500_v16  ;;  %2159 = vmatprep.subr.bf16.mxu1 %v3503_v17  ;;  %v3590_v16 = vld [vmem:[#allocation5 + $0x564] ss:$48 sps:$4 sm:$0xff]   ;;  %v3593_v17 = vld [vmem:[#allocation5 + $0x56c] ss:$48 sps:$4 sm:$0xff]  }
 0x12f   :  { %2078 = vmatpush1.bf16.msra.mxu0 %v3498_v18  ;;  %2160 = vmatpush1.bf16.msra.mxu1 %v3501_v19  ;;  %v3588_v18 = vld [vmem:[#allocation5 + $0x560] ss:$48 sps:$4 sm:$0xff]   ;;  %v3591_v19 = vld [vmem:[#allocation5 + $0x568] ss:$48 sps:$4 sm:$0xff]  }
 0x130   :  { %2186 = vmatprep.subr.bf16.mxu0 %v3506_v21  ;;  %2268 = vmatprep.subr.bf16.mxu1 %v3509_v22  ;;  %v3596_v21 = vld [vmem:[#allocation5 + $0x5c4] ss:$48 sps:$4 sm:$0xff]   ;;  %v3599_v22 = vld [vmem:[#allocation5 + $0x5cc] ss:$48 sps:$4 sm:$0xff]  }
 0x132   :  { %2096 = vmatmul.mubr.bf16.vlgmr.msra.gmra.mrb[4].mxu0 %v3991_v45  ;;  %2178 = vmatmul.mubr.bf16.vlgmr.msra.gmra.mrb[4].mxu1 %v3991_v45 }
 0x133   :  { %2187 = vmatpush1.bf16.msra.mxu0 %v3504_v23  ;;  %2269 = vmatpush1.bf16.msra.mxu1 %v3507_v24  ;;  %v3594_v23 = vld [vmem:[#allocation5 + $0x5c0] ss:$48 sps:$4 sm:$0xff]   ;;  %v3597_v24 = vld [vmem:[#allocation5 + $0x5c8] ss:$48 sps:$4 sm:$0xff]  }
 0x134   :  { %2188 = vmatprep.subr.bf16.mxu0 %v3512_v25  ;;  %2270 = vmatprep.subr.bf16.mxu1 %v3515_v26  ;;  %v3602_v25 = vld [vmem:[#allocation5 + $0x624] ss:$48 sps:$4 sm:$0xff]   ;;  %v3605_v26 = vld [vmem:[#allocation5 + $0x62c] ss:$48 sps:$4 sm:$0xff]  }
 0x135   :  { %2218 = vmatprep.mubr.bf16.mxu0 %v3979_v58  ;;  %2300 = vmatprep.mubr.bf16.mxu1 %v3979_v58  ;;  %v3539_v58 = vld [vmem:[#allocation5 + $0x20c] ss:$48 sps:$4 sm:$0xff]  }
 0x137   :  { %2189 = vmatpush1.bf16.msra.mxu0 %v3510_v27  ;;  %2271 = vmatpush1.bf16.msra.mxu1 %v3513_v28  ;;  %v3600_v27 = vld [vmem:[#allocation5 + $0x620] ss:$48 sps:$4 sm:$0xff]   ;;  %v3603_v28 = vld [vmem:[#allocation5 + $0x628] ss:$48 sps:$4 sm:$0xff]  }
 0x138   :  { %2190 = vmatprep.subr.bf16.mxu0 %v3518_v29  ;;  %2272 = vmatprep.subr.bf16.mxu1 %v3521_v30  ;;  %v3608_v29 = vld [vmem:[#allocation5 + $0x684] ss:$48 sps:$4 sm:$0xff]   ;;  %v3611_v30 = vld [vmem:[#allocation5 + $0x68c] ss:$48 sps:$4 sm:$0xff]  }
 0x13b   :  { %2191 = vmatpush1.bf16.msra.mxu0 %v3516_v31  ;;  %2273 = vmatpush1.bf16.msra.mxu1 %v3519_v32  ;;  %v3606_v31 = vld [vmem:[#allocation5 + $0x680] ss:$48 sps:$4 sm:$0xff]   ;;  %v3609_v32 = vld [vmem:[#allocation5 + $0x688] ss:$48 sps:$4 sm:$0xff]  }
 0x13c   :  { %2192 = vmatprep.subr.bf16.mxu0 %v3524_v33  ;;  %2274 = vmatprep.subr.bf16.mxu1 %v3527_v34  ;;  %v3614_v33 = vld [vmem:[#allocation5 + $0x6e4] ss:$48 sps:$4 sm:$0xff]   ;;  %v3617_v34 = vld [vmem:[#allocation5 + $0x6ec] ss:$48 sps:$4 sm:$0xff]  }
 0x13f   :  { %2193 = vmatpush1.bf16.msra.mxu0 %v3522_v35  ;;  %2275 = vmatpush1.bf16.msra.mxu1 %v3525_v36  ;;  %v3612_v35 = vld [vmem:[#allocation5 + $0x6e0] ss:$48 sps:$4 sm:$0xff]   ;;  %v3615_v36 = vld [vmem:[#allocation5 + $0x6e8] ss:$48 sps:$4 sm:$0xff]  }
 0x140   :  { %2194 = vmatprep.subr.bf16.mxu0 %v3530_v37  ;;  %2276 = vmatprep.subr.bf16.mxu1 %v3533_v38  ;;  %v3620_v37 = vld [vmem:[#allocation5 + $0x744] ss:$48 sps:$4 sm:$0xff]   ;;  %v3618_v38 = vld [vmem:[#allocation5 + $0x740] ss:$48 sps:$4 sm:$0xff]  }
 0x143   :  { %2195 = vmatpush1.bf16.msra.mxu0 %v3528_v39  ;;  %2277 = vmatpush1.bf16.msra.mxu1 %v3531_v40  ;;  %v3621_v39 = vld [vmem:[#allocation5 + $0x748] ss:$48 sps:$4 sm:$0xff]   ;;  %v3626_v40 = vld [vmem:[#allocation5 + $0x7a4] ss:$48 sps:$4 sm:$0xff]  }
 0x144   :  { %2196 = vmatprep.subr.bf16.mxu0 %v3536_v41  ;;  %2278 = vmatprep.subr.bf16.mxu1 %v3539_v58  ;;  %v3629_v41 = vld [vmem:[#allocation5 + $0x7ac] ss:$48 sps:$4 sm:$0xff]   ;;  %v3624_v58 = vld [vmem:[#allocation5 + $0x7a0] ss:$48 sps:$4 sm:$0xff]  }
 0x147   :  { %2197 = vmatpush1.bf16.msra.mxu0 %v3534_v42  ;;  %2279 = vmatpush1.bf16.msra.mxu1 %v3537_v43  ;;  %v3632_v42 = vld [vmem:[#allocation5 + $0x804] ss:$48 sps:$4 sm:$0xff]   ;;  %v3635_v43 = vld [vmem:[#allocation5 + $0x80c] ss:$48 sps:$4 sm:$0xff]  }
 0x148   :  { %2198 = vmatprep.subr.bf16.mxu0 %v3542_v44  ;;  %2280 = vmatprep.subr.bf16.mxu1 %v3545_v47  ;;  %v3630_v44 = vld [vmem:[#allocation5 + $0x800] ss:$48 sps:$4 sm:$0xff]   ;;  %v3633_v47 = vld [vmem:[#allocation5 + $0x808] ss:$48 sps:$4 sm:$0xff]  }
 0x14b   :  { %2199 = vmatpush1.bf16.msra.mxu0 %v3540_v48  ;;  %2281 = vmatpush1.bf16.msra.mxu1 %v3543_v49  ;;  %v3638_v48 = vld [vmem:[#allocation5 + $0x864] ss:$48 sps:$4 sm:$0xff]   ;;  %v3641_v49 = vld [vmem:[#allocation5 + $0x86c] ss:$48 sps:$4 sm:$0xff]  }
 0x14c   :  { %2200 = vmatprep.subr.bf16.mxu0 %v3548_v50  ;;  %2282 = vmatprep.subr.bf16.mxu1 %v3551_v51  ;;  %v3636_v50 = vld [vmem:[#allocation5 + $0x860] ss:$48 sps:$4 sm:$0xff]   ;;  %v3639_v51 = vld [vmem:[#allocation5 + $0x868] ss:$48 sps:$4 sm:$0xff]  }
 0x14f   :  { %2201 = vmatpush1.bf16.msra.mxu0 %v3546_v52  ;;  %2283 = vmatpush1.bf16.msra.mxu1 %v3549_v53  ;;  %v3644_v52 = vld [vmem:[#allocation5 + $0x8c4] ss:$48 sps:$4 sm:$0xff]   ;;  %v3647_v53 = vld [vmem:[#allocation5 + $0x8cc] ss:$48 sps:$4 sm:$0xff]  }
 0x150   :  { %2202 = vmatprep.subr.bf16.mxu0 %v3554_v54  ;;  %2284 = vmatprep.subr.bf16.mxu1 %v3557_v55  ;;  %v3642_v54 = vld [vmem:[#allocation5 + $0x8c0] ss:$48 sps:$4 sm:$0xff]   ;;  %v3645_v55 = vld [vmem:[#allocation5 + $0x8c8] ss:$48 sps:$4 sm:$0xff]  }
 0x153   :  { %2203 = vmatpush1.bf16.msra.mxu0 %v3552_v56  ;;  %2285 = vmatpush1.bf16.msra.mxu1 %v3555_v57 }
 0x154   :  { %2204 = vmatprep.subr.bf16.mxu0 %v3560_v59  ;;  %2286 = vmatprep.subr.bf16.mxu1 %v3563_v60 }
 0x157   :  { %2205 = vmatpush1.bf16.msra.mxu0 %v3558_v61  ;;  %2287 = vmatpush1.bf16.msra.mxu1 %v3561_v62 }
 0x158   :  { %2206 = vmatprep.subr.bf16.mxu0 %v3566_v63  ;;  %2288 = vmatprep.subr.bf16.mxu1 %v3569_v0 }
 0x15b   :  { %2207 = vmatpush1.bf16.msra.mxu0 %v3564_v1  ;;  %2289 = vmatpush1.bf16.msra.mxu1 %v3567_v2  ;;  %v3648_v2 = vld [vmem:[#allocation8 + $0x40] sm:$0xff]  }
 0x15c   :  { %2208 = vmatprep.subr.bf16.mxu0 %v3572_v3  ;;  %2290 = vmatprep.subr.bf16.mxu1 %v3575_v4  ;;  %v3858_v3 = vmov 0.0   ;;  %v3650_v4 = vld [vmem:[#allocation8 + $0x80] sm:$0xff]  }
 0x15f   :  { %2209 = vmatpush1.bf16.msra.mxu0 %v3570_v5  ;;  %2291 = vmatpush1.bf16.msra.mxu1 %v3573_v6  ;;  %v3651_v5 = vld [vmem:[#allocation8 + $0x48] sm:$0xff]  }
 0x160   :  { %2210 = vmatprep.subr.bf16.mxu0 %v3578_v7  ;;  %2292 = vmatprep.subr.bf16.mxu1 %v3581_v8  ;;  %v3652_v6 = vld [vmem:[#allocation8 + $0x8] sm:$0xff]   ;;  %v3654_v8 = vld [vmem:[#allocation8 + $0x50] sm:$0xff]  }
 0x161   :  { %v3653_v7 = vld [vmem:[#allocation8 + $0x88] sm:$0xff]  }
 0x163   :  { %2211 = vmatpush1.bf16.msra.mxu0 %v3576_v9  ;;  %2293 = vmatpush1.bf16.msra.mxu1 %v3579_v10  ;;  %v3655_v9 = vld [vmem:[#allocation8 + $0x10] sm:$0xff]  }
 0x164   :  { %2212 = vmatprep.subr.bf16.mxu0 %v3584_v12  ;;  %2294 = vmatprep.subr.bf16.mxu1 %v3587_v13  ;;  %v3656_v10 = vld [vmem:[#allocation8 + $0x90] sm:$0xff]   ;;  %v3657_v12 = vld [vmem:[#allocation8 + $0x58] sm:$0xff]  }
 0x165   :  { %v3658_v13 = vld [vmem:[#allocation8 + $0x18] sm:$0xff]  }
 0x167   :  { %2213 = vmatpush1.bf16.msra.mxu0 %v3582_v14  ;;  %2295 = vmatpush1.bf16.msra.mxu1 %v3585_v15  ;;  %v3659_v14 = vld [vmem:[#allocation8 + $0x98] sm:$0xff]   ;;  %v3660_v15 = vld [vmem:[#allocation8 + $0x60] sm:$0xff]  }
 0x168   :  { %2214 = vmatprep.subr.bf16.mxu0 %v3590_v16  ;;  %2296 = vmatprep.subr.bf16.mxu1 %v3593_v17  ;;  %v3661_v16 = vld [vmem:[#allocation8 + $0x20] sm:$0xff]  }
 0x169   :  { %v3662_v17 = vld [vmem:[#allocation8 + $0xa0] sm:$0xff]  }
 0x16b   :  { %2215 = vmatpush1.bf16.msra.mxu0 %v3588_v18  ;;  %2297 = vmatpush1.bf16.msra.mxu1 %v3591_v19  ;;  %v3663_v18 = vld [vmem:[#allocation8 + $0x68] sm:$0xff]  }
 0x16c   :  { %2216 = vmatprep.subr.bf16.mxu0 %v3596_v21  ;;  %2298 = vmatprep.subr.bf16.mxu1 %v3599_v22  ;;  %v3664_v19 = vld [vmem:[#allocation8 + $0x28] sm:$0xff]   ;;  %v3666_v22 = vld [vmem:[#allocation8 + $0x70] sm:$0xff]  }
 0x16d   :  { %v3665_v21 = vld [vmem:[#allocation8 + $0xa8] sm:$0xff]  }
 0x16f   :  { %2217 = vmatpush1.bf16.msra.mxu0 %v3594_v23  ;;  %2299 = vmatpush1.bf16.msra.mxu1 %v3597_v24  ;;  %v3667_v23 = vld [vmem:[#allocation8 + $0x30] sm:$0xff]  }
 0x170   :  { %2227 = vmatprep.subr.bf16.mxu0 %v3602_v25  ;;  %2309 = vmatprep.subr.bf16.mxu1 %v3605_v26  ;;  %v3668_v24 = vld [vmem:[#allocation8 + $0xb0] sm:$0xff]   ;;  %v3669_v25 = vld [vmem:[#allocation8 + $0x78] sm:$0xff]  }
 0x171   :  { %v3670_v26 = vld [vmem:[#allocation8 + $0x38] sm:$0xff]  }
 0x172   :  { %2219 = vmatmul.mubr.bf16.vlgmr.msra.gmra.mrb[8].mxu0 %v3983_v11  ;;  %2301 = vmatmul.mubr.bf16.vlgmr.msra.gmra.mrb[8].mxu1 %v3983_v11  ;;  %v3623_v11 = vld [vmem:[#allocation5 + $0x74c] ss:$48 sps:$4 sm:$0xff]  }
 0x173   :  { %2228 = vmatpush1.bf16.msra.mxu0 %v3600_v27  ;;  %2310 = vmatpush1.bf16.msra.mxu1 %v3603_v28  ;;  %v3671_v27 = vld [vmem:[#allocation8 + $0xb8] sm:$0xff]  }
 0x174   :  { %2229 = vmatprep.subr.bf16.mxu0 %v3608_v29  ;;  %2311 = vmatprep.subr.bf16.mxu1 %v3611_v30 }
 0x175   :  { %2259 = vmatprep.mubr.bf16.mxu0 %v3857_v20  ;;  %2341 = vmatprep.mubr.bf16.mxu1 %v3857_v20  ;;  %v3627_v20 = vld [vmem:[#allocation5 + $0x7a8] ss:$48 sps:$4 sm:$0xff]  }
 0x177   :  { %2230 = vmatpush1.bf16.msra.mxu0 %v3606_v31  ;;  %2312 = vmatpush1.bf16.msra.mxu1 %v3609_v32 }
 0x178   :  { %2231 = vmatprep.subr.bf16.mxu0 %v3614_v33  ;;  %2313 = vmatprep.subr.bf16.mxu1 %v3617_v34 }
 0x17b   :  { %2232 = vmatpush1.bf16.msra.mxu0 %v3612_v35  ;;  %2314 = vmatpush1.bf16.msra.mxu1 %v3615_v36 }
 0x17c   :  { %2233 = vmatprep.subr.bf16.mxu0 %v3620_v37  ;;  %2315 = vmatprep.subr.bf16.mxu1 %v3623_v11  ;;  %v2367_v11 = vsub.s32 1, %v3976_v46 }
 0x17f   :  { %2234 = vmatpush1.bf16.msra.mxu0 %v3618_v38  ;;  %2316 = vmatpush1.bf16.msra.mxu1 %v3621_v39  ;;  %v2359_v38 = vld [vmem:[#allocation7] sm:$0x7]  ;;  %v2363_v39 = vsub.s32 0, %v3976_v46 }
 0x180   :  { %2235 = vmatprep.subr.bf16.mxu0 %v3626_v40  ;;  %2317 = vmatprep.subr.bf16.mxu1 %v3629_v41  ;;  %v2371_v40 = vsub.s32 2, %v3976_v46 }
 0x183   :  { %2236 = vmatpush1.bf16.msra.mxu0 %v3624_v58  ;;  %2318 = vmatpush1.bf16.msra.mxu1 %v3627_v20 }
 0x184   :  { %2237 = vmatprep.subr.bf16.mxu0 %v3632_v42  ;;  %2319 = vmatprep.subr.bf16.mxu1 %v3635_v43  ;;  %v2368_v42 = vrot.slane %v2359_v38, %v2367_v11 }
 0x187   :  { %2238 = vmatpush1.bf16.msra.mxu0 %v3630_v44  ;;  %2320 = vmatpush1.bf16.msra.mxu1 %v3633_v47 }
 0x188   :  { %2239 = vmatprep.subr.bf16.mxu0 %v3638_v48  ;;  %2321 = vmatprep.subr.bf16.mxu1 %v3641_v49  ;;  %v2364_v48 = vrot.slane %v2359_v38, %v2363_v39 }
 0x18b   :  { %2240 = vmatpush1.bf16.msra.mxu0 %v3636_v50  ;;  %2322 = vmatpush1.bf16.msra.mxu1 %v3639_v51  ;;  %v2372_v50 = vrot.slane %v2359_v38, %v2371_v40 }
 0x18c   :  { %2241 = vmatprep.subr.bf16.mxu0 %v3644_v52  ;;  %2323 = vmatprep.subr.bf16.mxu1 %v3647_v53 }
 0x18f   :  { %2242 = vmatpush1.bf16.msra.mxu0 %v3642_v54  ;;  %2324 = vmatpush1.bf16.msra.mxu1 %v3645_v55 }
 0x190   :  { %3114 = vmatprep.subr.bf16.mxu0 %v3648_v2  ;;  %3148 = vmatprep.subr.bf16.mxu1 %v3858_v3 }
 0x192   :  { %2260 = vmatmul.mubr.bf16.vlgmr.msra.gmra.mrb[8].mxu0 %v3991_v45  ;;  %2342 = vmatmul.mubr.bf16.vlgmr.msra.gmra.mrb[8].mxu1 %v3991_v45  ;;  %v3649_v45 = vld [vmem:[#allocation8] sm:$0xff]  }
 0x193   :  { %3115 = vmatpush3.bf16.msra.mxu0 %v3649_v45  ;;  %3149 = vmatpush3.bf16.msra.mxu1 %v3650_v4 }
 0x194   :  { %3150 = vmatprep.subr.bf16.mxu1 %v3858_v3  ;;  %3116 = vmatprep.subr.bf16.mxu0 %v3651_v5 }
 0x195   :  { %3164 = vmatprep.mubr.msk.bf16.mxu1 %vm3859_vm0, %v3858_v3 }
 0x197   :  { %3117 = vmatpush3.bf16.msra.mxu0 %v3652_v6  ;;  %3151 = vmatpush3.bf16.msra.mxu1 %v3653_v7 }
 0x198   :  { %3152 = vmatprep.subr.bf16.mxu1 %v3858_v3  ;;  %3118 = vmatprep.subr.bf16.mxu0 %v3654_v8 }
 0x19b   :  { %3119 = vmatpush3.bf16.msra.mxu0 %v3655_v9  ;;  %3153 = vmatpush3.bf16.msra.mxu1 %v3656_v10 }
 0x19c   :  { %3154 = vmatprep.subr.bf16.mxu1 %v3858_v3  ;;  %3120 = vmatprep.subr.bf16.mxu0 %v3657_v12 }
 0x19f   :  { %3121 = vmatpush3.bf16.msra.mxu0 %v3658_v13  ;;  %3155 = vmatpush3.bf16.msra.mxu1 %v3659_v14 }
 0x1a0   :  { %3156 = vmatprep.subr.bf16.mxu1 %v3858_v3  ;;  %3122 = vmatprep.subr.bf16.mxu0 %v3660_v15 }
 0x1a3   :  { %3123 = vmatpush3.bf16.msra.mxu0 %v3661_v16  ;;  %3157 = vmatpush3.bf16.msra.mxu1 %v3662_v17 }
 0x1a4   :  { %3158 = vmatprep.subr.bf16.mxu1 %v3858_v3  ;;  %3124 = vmatprep.subr.bf16.mxu0 %v3663_v18 }
 0x1a5   :  { %v4011_v56 = vpop.f32.mrb[0].mxu0  ;;  %v4013_v57 = vpop.f32.mrb[0].mxu1 }
 0x1a6   :  { %v4015_v59 = vpop.f32.mrb[1].mxu0  ;;  %v4017_v60 = vpop.f32.mrb[1].mxu1 }
 0x1a7   :  { %v2350_v61 = vmax.f32 %v4011_v56, %v4017_v60  ;;  %v1937_v62 = vpop.f32.mrb[2].mxu0  ;;  %v2019_v63 = vpop.f32.mrb[2].mxu1  ;;  %3125 = vmatpush3.bf16.msra.mxu0 %v3664_v19  ;;  %3159 = vmatpush3.bf16.msra.mxu1 %v3665_v21 }
 0x1a8   :  { %v1938_v0 = vpop.f32.mrb[3].mxu0  ;;  %v2020_v1 = vpop.f32.mrb[3].mxu1  ;;  %3160 = vmatprep.subr.bf16.mxu1 %v3858_v3  ;;  %3126 = vmatprep.subr.bf16.mxu0 %v3666_v22 }
 0x1ab   :  { %3127 = vmatpush3.bf16.msra.mxu0 %v3667_v23  ;;  %3161 = vmatpush3.bf16.msra.mxu1 %v3668_v24 }
 0x1ac   :  { %3128 = vmatprep.subr.bf16.mxu0 %v3669_v25  ;;  %3162 = vmatprep.subr.bf16.mxu1 %v3858_v3 }
 0x1af   :  { %3129 = vmatpush3.bf16.msra.mxu0 %v3670_v26  ;;  %3163 = vmatpush3.bf16.msra.mxu1 %v3671_v27 }
 0x1b0   :  { %3168 = vmatprep.subr.bf16.mxu0 %v3858_v3 }
 0x205   :  { %v2097_v28 = vpop.f32.mrb[4].mxu0  ;;  %v2179_v29 = vpop.f32.mrb[4].mxu1 }
 0x206   :  { %v2351_v30 = vmax.f32 %v4015_v59, %v2097_v28  ;;  %v2099_v31 = vpop.f32.mrb[5].mxu0  ;;  %v2181_v32 = vpop.f32.mrb[5].mxu1 }
 0x207   :  { %v2352_v33 = vmax.f32 %v4013_v57, %v2099_v31  ;;  %v2101_v34 = vpop.f32.mrb[6].mxu0  ;;  %v2183_v35 = vpop.f32.mrb[6].mxu1 }
 0x208   :  { %v2102_v36 = vpop.f32.mrb[7].mxu0  ;;  %v2184_v37 = vpop.f32.mrb[7].mxu1  ;;  %v3672_v35 = vld [vmem:[%s4067_s5] sm:$0xff]  }
 0x209   :  { %v3673_v36 = vld [vmem:[%s4067_s5 + $0x8] sm:$0xff]  }
 0x20a   :  { %v3108_v37 = vld [vmem:[#allocation10] ss:$0 sm:$0xff] }
 0x265   :  { %v2261_v41 = vpop.f32.mrb[8].mxu0  ;;  %v2343_v58 = vpop.f32.mrb[8].mxu1 }
 0x266   :  { %v2354_v20 = vmax.f32 %v2181_v32, %v2343_v58  ;;  %v2263_v43 = vpop.f32.mrb[9].mxu0  ;;  %v2345_v44 = vpop.f32.mrb[9].mxu1 }
 0x267   :  { %v2353_v47 = vmax.f32 %v2179_v29, %v2263_v43  ;;  %v2355_v49 = vmax.f32 %v2261_v41, %v2345_v44  ;;  %v2265_v51 = vpop.f32.mrb[10].mxu0  ;;  %v2347_v52 = vpop.f32.mrb[10].mxu1 }
 0x268   :  { %v2357_v53 = vmax.f32 %v2351_v30, %v2354_v20  ;;  %v2266_v54 = vpop.f32.mrb[11].mxu0  ;;  %v2348_v55 = vpop.f32.mrb[11].mxu1 }
 0x269   :  { %v2356_v57 = vmax.f32 %v2350_v61, %v2353_v47  ;;  %v2358_v46 = vmax.f32 %v2352_v33, %v2355_v49  ;;  %v3110_v47 = vld [vmem:[#allocation11] ss:$0 sm:$0xff] }
 0x26a   :  { %v2377_v59 = vadd.f32 %v2368_v42, %v2357_v53 }
 0x26b   :  { %v2376_v62 = vadd.f32 %v2364_v48, %v2356_v57  ;;  %v2378_v63 = vadd.f32 %v2372_v50, %v2358_v46 }
 0x26c   :  { %v2380_v0 = vmin.f32 %v2377_v59, 0.0  ;;  %vm2395_vm1 = vcmp.gt.f32.partialorder %v2377_v59, 0.0 }
 0x26d   :  { %v2379_v1 = vmin.f32 %v2376_v62, 0.0  ;;  %v2381_v2 = vmin.f32 %v2378_v63, 0.0  ;;  %vm2394_vm2 = vcmp.gt.f32.partialorder %v2376_v62, 0.0  ;;  %vm2396_vm3 = vcmp.gt.f32.partialorder %v2378_v63, 0.0 }
 0x26e   :  { %v2384_v45 = vmul.f32 1.442695, %v2380_v0 }
 0x26f   :  { %v2382_v4 = vmul.f32 1.442695, %v2379_v1  ;;  %v2386_v5 = vmul.f32 1.442695, %v2381_v2 }
 0x270   :  { %3674 = vpow2.f32 %v2384_v45 }
 0x271   :  { %3676 = vpow2.f32 %v2382_v4 }
 0x272   :  { %3678 = vpow2.f32 %v2386_v5 }
 0x27a   :  { %v3675_v6 = vpop.eup %3674 }
 0x27b   :  { %v3677_v7 = vpop.eup %3676  ;;  %v3082_v8 = vadd.f32 -1.0, %v3675_v6 }
 0x27c   :  { %v3679_v9 = vpop.eup %3678  ;;  %v3081_v10 = vadd.f32 -1.0, %v3677_v7 }
 0x27d   :  { %v3083_v56 = vadd.f32 -1.0, %v3679_v9  ;;  %v2392_v60 = vmul.f32 1.6732632, %v3082_v8 }
 0x27e   :  { %v2391_v61 = vmul.f32 1.6732632, %v3081_v10 }
 0x27f   :  { %v2398_v12 = vsel %vm2395_vm1, %v2377_v59, %v2392_v60  ;;  %v2393_v13 = vmul.f32 1.6732632, %v3083_v56 }
 0x280   :  { %v2401_v14 = vmul.f32 1.050701, %v2398_v12  ;;  %v2397_v15 = vsel %vm2394_vm2, %v2376_v62, %v2391_v61 }
 0x281   :  { %v2400_v16 = vmul.f32 1.050701, %v2397_v15  ;;  %v2399_v17 = vsel %vm2396_vm3, %v2378_v63, %v2393_v13 }
 0x282   :  { %v2404_v18 = vpack.c.bf16 %v2401_v14, %v2401_v14  ;;  %v2402_v19 = vmul.f32 1.050701, %v2399_v17 }
 0x283   :  { %v2403_v21 = vpack.c.bf16 %v2400_v16, %v2400_v16 }
 0x284   :  { %2630 = vmatprep.mubr.bf16.mxu0 %v2404_v18  ;;  %v2405_v22 = vpack.c.bf16 %v2402_v19, %v2402_v19 }
 0x285   :  { %2631 = vmatmul.mubr.bf16.vlgmr.msra.gmra.mrb[12].mxu0 %v2403_v21 }
 0x286   :  { %3165 = vmatmul.mubr.bf16.vlgmr.msra.gmra.mrb[12].mxu1 %v2405_v22  ;;  %3172 = vmatprep.mubr.msk.bf16.mxu0 %vm3859_vm0, %v3858_v3 }
 0x287   :  { %3169 = vmatpush3.bf16.msra.mxu0 %v3672_v35 }
 0x288   :  { %3170 = vmatprep.subr.bf16.mxu0 %v3858_v3 }
 0x28b   :  { %3171 = vmatpush3.bf16.msra.mxu0 %v3673_v36 }
 0x358   :  { %v3130_v23 = vpop.f32.mrb[12].mxu0 }
 0x359   :  { %v2672_v24 = vpop.f32.mrb[12].mxu1  ;;  %v3131_v25 = vpop.f32.mrb[13].mxu0 }
 0x35a   :  { %v3132_v26 = vadd.f32 %v3131_v25, %v3130_v23  ;;  %v3166_v27 = vpop.f32.mrb[13].mxu1  ;;  %v3133_v28 = vpop.f32.mrb[14].mxu0 }
 0x35b   :  { %v2675_v29 = vpop.f32.mrb[14].mxu1  ;;  %v3134_v30 = vpop.f32.mrb[15].mxu0 }
 0x35c   :  { %v3167_v31 = vpop.f32.mrb[15].mxu1  ;;  %v2673_v32 = vadd.f32 %v3132_v26, %v2672_v24 }
 0x35e   :  { %2679 = vrot.lane.b32.xlu0 %v2673_v32, %s3860_s6 }
 0x3d0   :  { %v2680_v33 = vpop.permute.xlu0 %2679 }
 0x3d1   :  { %v2682_v34 = vmax.f32 %v2673_v32, %v2680_v33 }
 0x3d3   :  { %2684 = vrot.lane.b32.xlu0 %v2682_v34, %s3850_s1  ;;  %s3861_s1 = smov [#allocation13]  }
 0x3d4   :  { %s2780_s5 = sshll.u32 %s3861_s1, 4  ;;  %s2781_s5 = int_to_ptr.vmem [resolvable:$true] %s2780_s5 }
 0x3d5   :  { %s3814_s10 = scalar_lea.vmem %s2781_s5, 32  ;;  %p3819_p7 = scmp.lt.s32.totalorder %s2781_s5, %s2781_s5 }
 0x3d6   :  { %p3815_p6 = scmp.ne.s32.totalorder %s2781_s5, %s3814_s10  ;;  %p3820_p8 = scmp.lt.s32.totalorder %s3814_s10, %s3814_s10 }
 0x3d8   :  { %p3821_p9 = por %p3820_p8, %p3819_p7 }
 0x3da   :  { %p3822_p10 = pnand %p3821_p9, %p3815_p6 }
 0x445   :  { %v2685_v11 = vpop.permute.xlu0 %2684 }
 0x446   :  { %v2687_v38 = vmax.f32 %v2682_v34, %v2685_v11 }
 0x448   :  { %v2695_v39 = vadd.f32 %v3108_v37, %v2687_v38 }
 0x44a   :  { %v2696_v40 = vmin.f32 %v2695_v39, 0.0  ;;  %vm2701_vm4 = vcmp.gt.f32.partialorder %v2695_v39, 0.0 }
 0x44c   :  { %v2697_v41 = vmul.f32 1.442695, %v2696_v40 }
 0x44e   :  { %3680 = vpow2.f32 %v2697_v41 }
 0x458   :  { %v3681_v58 = vpop.eup %3680 }
 0x459   :  { %v3109_v20 = vadd.f32 -1.0, %v3681_v58 }
 0x45b   :  { %v2700_v42 = vmul.f32 1.6732632, %v3109_v20 }
 0x45d   :  { %v2702_v43 = vsel %vm2701_vm4, %v2695_v39, %v2700_v42 }
 0x45e   :  { %v2703_v44 = vmul.f32 1.050701, %v2702_v43 }
 0x460   :  { %v2704_v3 = vpack.c.bf16 %v2703_v44, %v2703_v44 }
 0x462   :  { %3173 = vmatmul.mubr.msk.bf16.vlgmr.msra.gmra.mrb[16].mxu0 %vm2728_vm5, %v2704_v3 }
 0x535   :  { %v2766_v48 = vpop.f32.mrb[16].mxu0 }
 0x536   :  { %v2767_v49 = vadd.f32 %v3110_v47, %v2766_v48  ;;  %v3174_v50 = vpop.f32.mrb[17].mxu0 }
 0x537   :  { %v2769_v51 = vpop.f32.mrb[18].mxu0 }
 0x538   :  { %v3175_v52 = vpop.f32.mrb[19].mxu0  ;;  %2773 = vst.msk [vmem:[#allocation13] sm:$0x3] %vm2772_vm6, %v2767_v49 }
 0x539   :  { %3825 = shalt.err (!%p3822_p10)
}
 0x53a   :  { %s3826_s13 = scalar_lea.hbm %s4069_s7, 32 }
 0x53b   :  { %p3827_p11 = scmp.ne.s32.totalorder %s4069_s7, %s3826_s13  ;;  %p3830_p12 = scmp.lt.u32.totalorder %s3826_s13, %s4069_s7 }
 0x53d   :  { %p3832_p13 = pnand %p3830_p12, %p3827_p11 }
 0x53f   :  { %3835 = shalt.err (!%p3832_p13)
}
 0x540   :  { %2783 = dma.vmem_to_hbm [thread:$0]  %s2781_s5, 32, %s4069_s7, [#allocation4]  }
 0x541   :  { %3844 = dma.done.wait [#allocation4], 32  }
 0x542   :  { %3845 = vsyncadd [#allocation4], 4294967264 }
 0x543   :  { %2787 = vsyncpa [#allocation3], 1 }
 0x544   :  { %2788 = vsyncpa [#allocation6], 1 }
 0x545   :  { %2789 = vsyncpa [#allocation9], 1 }
 0x546   :  { %2790 = vsyncpa [#allocation12], 1 }
 0x547   :  { %2791 = vsyncpa [#allocation4], 1 }

</bundles_post_ra>
